<compile_context>
chip_gen: v7x
topology: tpu7x:2x2x1
jax: 0.10.0
libtpu: 0.0.40
codegen_flags: <defaults>
</compile_context>

<pallas_src>
import functools

import jax
import jax.numpy as jnp
from jax import lax
from jax.experimental import pallas as pl
from jax.experimental.pallas import tpu as pltpu

LANE = 128
LN_EPS = 1e-6
MASK_NEG = -1e30


def _round_up(x, m):
    return (x + m - 1) // m * m


# --------------------------------------------------------------------------- #
# math helpers shared by the kernel and the pure-JAX reference
# --------------------------------------------------------------------------- #
def _layer_norm(x):
    # nn.LayerNorm(elementwise_affine=False, eps=1e-6): biased variance over last dim.
    mu = jnp.mean(x, axis=-1, keepdims=True)
    xc = x - mu
    var = jnp.mean(xc * xc, axis=-1, keepdims=True)
    return xc * lax.rsqrt(var + LN_EPS)


def _silu(x):
    return x * jax.nn.sigmoid(x)


def _gelu_exact(x):
    # PyTorch nn.GELU() default (approximate='none')
    return 0.5 * x * (1.0 + lax.erf(x * 0.7071067811865476))


def _mxu_dot(a, b):
    # bf16 x bf16 MXU matmul with f32 accumulation.
    return jnp.dot(a.astype(jnp.bfloat16), b.astype(jnp.bfloat16),
                   preferred_element_type=jnp.float32)


def _dot_nt(a, b):
    # a @ b.T with bf16 operands, f32 accumulation (contraction on last dims).
    return lax.dot_general(a.astype(jnp.bfloat16), b.astype(jnp.bfloat16),
                           (((1,), (1,)), ((), ())),
                           preferred_element_type=jnp.float32)


def _mm(x, w, b):
    return _mxu_dot(x, w) + b


def _pad_last(x, width):
    pad = width - x.shape[-1]
    if pad == 0:
        return x
    cfg = [(0, 0)] * (x.ndim - 1) + [(0, pad)]
    return jnp.pad(x, cfg)


# --------------------------------------------------------------------------- #
# fused Pallas kernel: grid = (batch, layer); one sequence per batch step
# --------------------------------------------------------------------------- #
def _gpt_adaln_kernel(num_heads,
                      state_ref, act_ref, pos_ref,
                      ws_ref, bs_ref, wa_ref, ba_ref,
                      wmod_ref, bmod_ref,
                      wq_ref, bq_ref, wk_ref, bk_ref,
                      wv_ref, bv_ref, wo_ref, bo_ref,
                      w1_ref, b1_ref, w2_ref, b2_ref,
                      wmf_ref, bmf_ref, wlin_ref, blin_ref,
                      out_ref,
                      x_sc, c_sc):
    layer = pl.program_id(1)
    n_layers = pl.num_programs(1)
    n, d = pos_ref.shape
    hd = d // num_heads
    inv_sqrt_hd = jnp.float32(1.0 / (hd ** 0.5))

    # Causal additive mask generated in-kernel (finite -> NaN-safe): a few VPU ops,
    # no O((B*n)^2) HBM DMA or VMEM buffer.
    row = lax.broadcasted_iota(jnp.int32, (n, n), 0)
    col = lax.broadcasted_iota(jnp.int32, (n, n), 1)
    mask = jnp.where(row >= col, jnp.float32(0.0), jnp.float32(MASK_NEG))

    # ---- layer 0: embeddings + conditioning (padded weight rows are zero) ----
    @pl.when(layer == 0)
    def _():
        cond = pos_ref[...] + _mm(state_ref[...], ws_ref[...], bs_ref[...])
        c_sc[...] = _silu(cond).astype(jnp.bfloat16)       # hoisted bf16 cast, reused 6L+2 times
        x_sc[...] = _gelu_exact(_mm(act_ref[...], wa_ref[...], ba_ref[...]))

    silu_c = c_sc[...]                                     # (n, d) bf16
    x = x_sc[...]                                          # (n, d) f32 residual

    # ---- adaLN modulations (chunk-major stacked weights: free leading-dim slices) ----
    def mod(c):
        return (jnp.dot(silu_c, wmod_ref[c], preferred_element_type=jnp.float32)
                + bmod_ref[c])

    shift_msa, scale_msa, gate_msa = mod(0), mod(1), mod(2)
    shift_mlp, scale_mlp, gate_mlp = mod(3), mod(4), mod(5)

    # ---- attention branch ----
    h = (_layer_norm(x) * (1.0 + scale_msa) + shift_msa).astype(jnp.bfloat16)  # single cast
    q = (jnp.dot(h, wq_ref[...], preferred_element_type=jnp.float32)
         + bq_ref[...]).astype(jnp.bfloat16)
    k = (jnp.dot(h, wk_ref[...], preferred_element_type=jnp.float32)
         + bk_ref[...]).astype(jnp.bfloat16)
    v = (jnp.dot(h, wv_ref[...], preferred_element_type=jnp.float32)
         + bv_ref[...]).astype(jnp.bfloat16)
    wo = wo_ref[...]

    attn = jnp.zeros((n, d), jnp.float32)
    for hh in range(num_heads):
        sl = slice(hh * hd, (hh + 1) * hd)
        sc = lax.dot_general(q[:, sl], k[:, sl], (((1,), (1,)), ((), ())),
                             preferred_element_type=jnp.float32) * inv_sqrt_hd + mask
        sc = sc - jnp.max(sc, axis=-1, keepdims=True)
        p = jnp.exp(sc)
        # EUP approximate reciprocal: softmax rows sum to 1 within ~1e-3 (documented).
        p = p * pl.reciprocal(jnp.sum(p, axis=-1, keepdims=True), approx=True)
        ctx = jnp.dot(p.astype(jnp.bfloat16), v[:, sl],
                      preferred_element_type=jnp.float32)
        # push each head's context through its rows of W_O and accumulate (no concat)
        attn = attn + jnp.dot(ctx.astype(jnp.bfloat16), wo[sl, :],
                              preferred_element_type=jnp.float32)
    attn = attn + bo_ref[...]

    x = x + gate_msa * attn

    # ---- MLP branch ----
    h2 = (_layer_norm(x) * (1.0 + scale_mlp) + shift_mlp).astype(jnp.bfloat16)
    f = _gelu_exact(jnp.dot(h2, w1_ref[...], preferred_element_type=jnp.float32)
                    + b1_ref[...])
    f = (jnp.dot(f.astype(jnp.bfloat16), w2_ref[...],
                 preferred_element_type=jnp.float32) + b2_ref[...])
    x = x + gate_mlp * f

    x_sc[...] = x

    # ---- FinalLayer (critic=False, gauss=False path) on the last layer step ----
    @pl.when(layer == n_layers - 1)
    def _():
        shift = (jnp.dot(silu_c, wmf_ref[0], preferred_element_type=jnp.float32)
                 + bmf_ref[0])
        scale = (jnp.dot(silu_c, wmf_ref[1], preferred_element_type=jnp.float32)
                 + bmf_ref[1])
        hf = (_layer_norm(x) * (1.0 + scale) + shift).astype(jnp.bfloat16)
        out_ref[...] = (jnp.dot(hf, wlin_ref[...], preferred_element_type=jnp.float32)
                        + blin_ref[...]).astype(out_ref.dtype)


# --------------------------------------------------------------------------- #
# wrapper
# --------------------------------------------------------------------------- #
def gpt_adaln_forward(params, state, actions, pos, num_heads):
    """state (B, n, state_dim); actions (B, n, action_dim); pos (B, n, 1) int32."""
    bsz, n, _ = state.shape
    adim = actions.shape[-1]
    d = params["pos_table"].shape[-1]
    n_layers = params["wq"].shape[0]
    sp = params["w_state"].shape[0]
    ap = params["w_act"].shape[0]
    ff = params["w1"].shape[-1]
    op = params["w_lin"].shape[-1]

    # nn.Embedding-style gather stays in plain JAX glue.
    pos_embed = jnp.take(params["pos_table"], pos[..., 0], axis=0)    # (B, n, d) f32
    state_p = _pad_last(state, sp)                                    # (B, n, sp)
    act_p = _pad_last(actions, ap)                                    # (B, n, ap)

    # BlockSpec helpers.  Batch blocks follow the (parallel) batch axis; per-layer
    # stacked weights follow the (arbitrary) layer axis so only ~2 layers of weights
    # are VMEM-resident; small shared weights stay at a constant block (no re-DMA).
    def batch_spec(*tail):
        zeros = (0,) * len(tail)
        return pl.BlockSpec((None,) + tail, lambda b, l: (b,) + zeros)

    def layer_spec(*tail):
        zeros = (0,) * len(tail)
        return pl.BlockSpec((None,) + tail, lambda b, l: (l,) + zeros)

    def const_spec(*shape):
        zeros = (0,) * len(shape)
        return pl.BlockSpec(shape, lambda b, l: zeros)

    in_specs = [
        batch_spec(n, sp), batch_spec(n, ap), batch_spec(n, d),
        const_spec(sp, d), const_spec(1, d), const_spec(ap, d), const_spec(1, d),
        layer_spec(6, d, d), layer_spec(6, 1, d),
        layer_spec(d, d), layer_spec(1, d),     # W_Q, b_Q
        layer_spec(d, d), layer_spec(1, d),     # W_K, b_K
        layer_spec(d, d), layer_spec(1, d),     # W_V, b_V
        layer_spec(d, d), layer_spec(1, d),     # W_O, b_O
        layer_spec(d, ff), layer_spec(1, ff),   # fc1
        layer_spec(ff, d), layer_spec(1, d),    # fc2
        const_spec(2, d, d), const_spec(2, 1, d),
        const_spec(d, op), const_spec(1, op),
    ]
    out_spec = batch_spec(n, op)

    grid_spec = pltpu.PrefetchScalarGridSpec(
        num_scalar_prefetch=0,
        grid=(bsz, n_layers),
        in_specs=in_specs,
        out_specs=out_spec,
        scratch_shapes=[pltpu.VMEM((n, d), jnp.float32),     # residual x
                        pltpu.VMEM((n, d), jnp.bfloat16)],   # SiLU(cond), bf16
    )

    out = pl.pallas_call(
        functools.partial(_gpt_adaln_kernel, num_heads),
        out_shape=jax.ShapeDtypeStruct((bsz, n, op), jnp.float32),
        grid_spec=grid_spec,
        compiler_params=pltpu.CompilerParams(
            # batch axis shards across TensorCores (v7x); layer axis carries scratch.
            dimension_semantics=("parallel", "arbitrary"),
            # generation-safe cap: fits v7x's 64 MiB physical VMEM, ample on v5e/v6e.
            vmem_limit_bytes=48 * 1024 * 1024),
    )(state_p, act_p, pos_embed,
      params["w_state"], params["b_state"], params["w_act"], params["b_act"],
      params["w_mod"], params["b_mod"],
      params["wq"], params["bq"], params["wk"], params["bk"],
      params["wv"], params["bv"], params["wo"], params["bo"],
      params["w1"], params["b1"], params["w2"], params["b2"],
      params["w_mod_f"], params["b_mod_f"], params["w_lin"], params["b_lin"])

    return out[..., :adim]


# --------------------------------------------------------------------------- #
# deterministic parameter init (synthetic — NOT matching torch orthogonal init)
# --------------------------------------------------------------------------- #
def init_params(key, state_dim, model_dim, action_dim, num_heads, max_agents,
                dim_ff, n_layers, weight_dtype=jnp.bfloat16):
    """Weights stored pre-transposed (in, out), stacked over layers, chunk-major for
    the adaLN modulations, zero-padded on tiny in/out dims, cast to bf16. Biases f32."""
    del num_heads  # only used for shapes elsewhere
    sp = _round_up(state_dim, LANE)
    ap = _round_up(action_dim, LANE)
    op = _round_up(action_dim, LANE)

    def lin(k, fi, fo, fi_pad=None, fo_pad=None):
        w = jax.random.normal(k, (fi, fo), jnp.float32) / jnp.sqrt(jnp.float32(fi))
        if fi_pad is not None and fi_pad > fi:
            w = jnp.pad(w, ((0, fi_pad - fi), (0, 0)))
        if fo_pad is not None and fo_pad > fo:
            w = jnp.pad(w, ((0, 0), (0, fo_pad - fo)))
        b = jnp.zeros((1, w.shape[1]), jnp.float32)
        return w.astype(weight_dtype), b

    def lin_chunks(k, fi, fo, nchunks):
        w = jax.random.normal(k, (nchunks, fi, fo), jnp.float32) / jnp.sqrt(jnp.float32(fi))
        b = jnp.zeros((nchunks, 1, fo), jnp.float32)
        return w.astype(weight_dtype), b

    keys = jax.random.split(key, n_layers + 4)
    p = {}
    p["w_state"], p["b_state"] = lin(keys[0], state_dim, model_dim, fi_pad=sp)
    p["w_act"], p["b_act"] = lin(keys[1], action_dim, model_dim, fi_pad=ap)
    p["pos_table"] = 0.02 * jax.random.normal(keys[2], (max_agents, model_dim), jnp.float32)

    per_layer = {k: [] for k in ("w_mod", "b_mod", "wq", "bq", "wk", "bk",
                                 "wv", "bv", "wo", "bo", "w1", "b1", "w2", "b2")}
    for i in range(n_layers):
        lk = jax.random.split(keys[3 + i], 7)
        wm, bm = lin_chunks(lk[0], model_dim, model_dim, 6)
        wq, bq = lin(lk[1], model_dim, model_dim)
        wk_, bk_ = lin(lk[2], model_dim, model_dim)
        wv, bv = lin(lk[3], model_dim, model_dim)
        wo, bo = lin(lk[4], model_dim, model_dim)
        w1, b1 = lin(lk[5], model_dim, dim_ff)
        w2, b2 = lin(lk[6], dim_ff, model_dim)
        for name, val in (("w_mod", wm), ("b_mod", bm), ("wq", wq), ("bq", bq),
                          ("wk", wk_), ("bk", bk_), ("wv", wv), ("bv", bv),
                          ("wo", wo), ("bo", bo), ("w1", w1), ("b1", b1),
                          ("w2", w2), ("b2", b2)):
            per_layer[name].append(val)
    for name, vals in per_layer.items():
        p[name] = jnp.stack(vals, axis=0)

    fk = jax.random.split(keys[3 + n_layers], 2)
    p["w_mod_f"], p["b_mod_f"] = lin_chunks(fk[0], model_dim, model_dim, 2)
    p["w_lin"], p["b_lin"] = lin(fk[1], model_dim, action_dim, fo_pad=op)
    return p


# --------------------------------------------------------------------------- #
# pure-JAX reference (same bf16 weights & math, exact softmax division)
# --------------------------------------------------------------------------- #
def ref_forward(params, state, actions, pos, num_heads):
    bsz, n, _ = state.shape
    adim = actions.shape[-1]
    d = params["pos_table"].shape[-1]
    m = bsz * n
    hd = d // num_heads
    inv_sqrt_hd = jnp.float32(1.0 / (hd ** 0.5))
    n_layers = params["wq"].shape[0]

    pos_embed = jnp.take(params["pos_table"], pos[..., 0], axis=0).reshape(m, d)
    state_p = _pad_last(state, params["w_state"].shape[0]).reshape(m, -1)
    act_p = _pad_last(actions, params["w_act"].shape[0]).reshape(m, -1)

    r = jnp.arange(n)
    causal = jnp.where(r[:, None] >= r[None, :], 0.0, MASK_NEG).astype(jnp.float32)

    cond = pos_embed + _mm(state_p, params["w_state"], params["b_state"])
    x = _gelu_exact(_mm(act_p, params["w_act"], params["b_act"]))
    silu_c = _silu(cond)

    for l in range(n_layers):
        wmod_l, bmod_l = params["w_mod"][l], params["b_mod"][l]
        mods = [_mm(silu_c, wmod_l[c], bmod_l[c]) for c in range(6)]
        shift_msa, scale_msa, gate_msa, shift_mlp, scale_mlp, gate_mlp = mods

        h = _layer_norm(x) * (1.0 + scale_msa) + shift_msa
        q = _mm(h, params["wq"][l], params["bq"][l])
        k = _mm(h, params["wk"][l], params["bk"][l])
        v = _mm(h, params["wv"][l], params["bv"][l])
        wo_l = params["wo"][l]

        per_batch = []
        for b in range(bsz):
            rows = slice(b * n, (b + 1) * n)
            acc = jnp.zeros((n, d), jnp.float32)
            for hh in range(num_heads):
                sl = slice(hh * hd, (hh + 1) * hd)
                sc = _dot_nt(q[rows, sl], k[rows, sl]) * inv_sqrt_hd + causal
                sc = sc - jnp.max(sc, axis=-1, keepdims=True)
                pr = jnp.exp(sc)
                pr = pr / jnp.sum(pr, axis=-1, keepdims=True)
                acc = acc + _mxu_dot(_mxu_dot(pr, v[rows, sl]), wo_l[sl, :])
            per_batch.append(acc)
        attn = jnp.concatenate(per_batch, axis=0) + params["bo"][l]
        x = x + gate_msa * attn

        h2 = _layer_norm(x) * (1.0 + scale_mlp) + shift_mlp
        f = _gelu_exact(_mm(h2, params["w1"][l], params["b1"][l]))
        f = _mm(f, params["w2"][l], params["b2"][l])
        x = x + gate_mlp * f

    shift = _mm(silu_c, params["w_mod_f"][0], params["b_mod_f"][0])
    scale = _mm(silu_c, params["w_mod_f"][1], params["b_mod_f"][1])
    h = _layer_norm(x) * (1.0 + scale) + shift
    out = _mm(h, params["w_lin"], params["b_lin"])
    return out[:, :adim].reshape(bsz, n, adim)


# --------------------------------------------------------------------------- #
if __name__ == "__main__":
    B, N_AGENTS = 2, 8
    STATE_DIM, ACTION_DIM, MODEL_DIM = 6, 2, 32
    NUM_HEADS, DIM_FF, N_LAYERS, MAX_AGENTS = 4, 64, 2, 8

    key = jax.random.PRNGKey(0)
    kp, ks, ka, kpos = jax.random.split(key, 4)

    params = init_params(kp, STATE_DIM, MODEL_DIM, ACTION_DIM, NUM_HEADS,
                         MAX_AGENTS, DIM_FF, N_LAYERS)
    state = jax.random.normal(ks, (B, N_AGENTS, STATE_DIM), jnp.float32)
    actions = jax.random.normal(ka, (B, N_AGENTS, ACTION_DIM), jnp.float32)
    pos = jax.random.randint(kpos, (B, N_AGENTS, 1), 0, MAX_AGENTS, dtype=jnp.int32)

    fwd = jax.jit(functools.partial(gpt_adaln_forward, num_heads=NUM_HEADS))
    out = jax.block_until_ready(fwd(params, state, actions, pos))

    assert out.shape == (B, N_AGENTS, ACTION_DIM), out.shape
    assert bool(jnp.all(jnp.isfinite(out)))

    ref = ref_forward(params, state, actions, pos, NUM_HEADS)
    # tolerance covers the EUP approximate-reciprocal softmax normalization in the
    # kernel (the reference divides exactly); bf16 weights are identical on both sides.
    assert bool(jnp.allclose(out, ref, atol=1e-2, rtol=1e-2)), (
        float(jnp.max(jnp.abs(out - ref))))

    print("KERNEL_OK")
</pallas_src>

<mosaic_0001>
module attributes {stable_mosaic.version = 11 : i64} {
  func.func @_gpt_adaln_kernel(%arg0: i32, %arg1: i32, %arg2: memref<1x8x128xf32, #tpu.memory_space<vmem>>, %arg3: memref<1x8x128xf32, #tpu.memory_space<vmem>>, %arg4: memref<1x8x32xf32, #tpu.memory_space<vmem>>, %arg5: memref<128x32xbf16, #tpu.memory_space<vmem>>, %arg6: memref<1x32xf32, #tpu.memory_space<vmem>>, %arg7: memref<128x32xbf16, #tpu.memory_space<vmem>>, %arg8: memref<1x32xf32, #tpu.memory_space<vmem>>, %arg9: memref<1x6x32x32xbf16, #tpu.memory_space<vmem>>, %arg10: memref<1x6x1x32xf32, #tpu.memory_space<vmem>>, %arg11: memref<1x32x32xbf16, #tpu.memory_space<vmem>>, %arg12: memref<1x1x32xf32, #tpu.memory_space<vmem>>, %arg13: memref<1x32x32xbf16, #tpu.memory_space<vmem>>, %arg14: memref<1x1x32xf32, #tpu.memory_space<vmem>>, %arg15: memref<1x32x32xbf16, #tpu.memory_space<vmem>>, %arg16: memref<1x1x32xf32, #tpu.memory_space<vmem>>, %arg17: memref<1x32x32xbf16, #tpu.memory_space<vmem>>, %arg18: memref<1x1x32xf32, #tpu.memory_space<vmem>>, %arg19: memref<1x32x64xbf16, #tpu.memory_space<vmem>>, %arg20: memref<1x1x64xf32, #tpu.memory_space<vmem>>, %arg21: memref<1x64x32xbf16, #tpu.memory_space<vmem>>, %arg22: memref<1x1x32xf32, #tpu.memory_space<vmem>>, %arg23: memref<2x32x32xbf16, #tpu.memory_space<vmem>>, %arg24: memref<2x1x32xf32, #tpu.memory_space<vmem>>, %arg25: memref<32x128xbf16, #tpu.memory_space<vmem>>, %arg26: memref<1x128xf32, #tpu.memory_space<vmem>>, %arg27: memref<1x8x128xf32, #tpu.memory_space<vmem>>, %arg28: memref<8x32xf32, #tpu.memory_space<vmem>>, %arg29: memref<8x32xbf16, #tpu.memory_space<vmem>>) attributes {dimension_semantics = [#tpu.dimension_semantics<parallel>, #tpu.dimension_semantics<arbitrary>], iteration_bounds = array<i64: 2, 2>, scalar_prefetch = 0 : i64, scratch_operands = 2 : i64, tpu.core_type = #tpu.core_type<tc>, window_params = [{transform_indices = @transform_0, window_bounds = array<i64: 1, 8, 128>}, {transform_indices = @transform_1, window_bounds = array<i64: 1, 8, 128>}, {transform_indices = @transform_2, window_bounds = array<i64: 1, 8, 32>}, {pipeline_mode = #tpu.pipeline_mode<synchronous>, transform_indices = @transform_3, window_bounds = array<i64: 128, 32>}, {pipeline_mode = #tpu.pipeline_mode<synchronous>, transform_indices = @transform_4, window_bounds = array<i64: 1, 32>}, {pipeline_mode = #tpu.pipeline_mode<synchronous>, transform_indices = @transform_5, window_bounds = array<i64: 128, 32>}, {pipeline_mode = #tpu.pipeline_mode<synchronous>, transform_indices = @transform_6, window_bounds = array<i64: 1, 32>}, {transform_indices = @transform_7, window_bounds = array<i64: 1, 6, 32, 32>}, {transform_indices = @transform_8, window_bounds = array<i64: 1, 6, 1, 32>}, {transform_indices = @transform_9, window_bounds = array<i64: 1, 32, 32>}, {transform_indices = @transform_10, window_bounds = array<i64: 1, 1, 32>}, {transform_indices = @transform_11, window_bounds = array<i64: 1, 32, 32>}, {transform_indices = @transform_12, window_bounds = array<i64: 1, 1, 32>}, {transform_indices = @transform_13, window_bounds = array<i64: 1, 32, 32>}, {transform_indices = @transform_14, window_bounds = array<i64: 1, 1, 32>}, {transform_indices = @transform_15, window_bounds = array<i64: 1, 32, 32>}, {transform_indices = @transform_16, window_bounds = array<i64: 1, 1, 32>}, {transform_indices = @transform_17, window_bounds = array<i64: 1, 32, 64>}, {transform_indices = @transform_18, window_bounds = array<i64: 1, 1, 64>}, {transform_indices = @transform_19, window_bounds = array<i64: 1, 64, 32>}, {transform_indices = @transform_20, window_bounds = array<i64: 1, 1, 32>}, {pipeline_mode = #tpu.pipeline_mode<synchronous>, transform_indices = @transform_21, window_bounds = array<i64: 2, 32, 32>}, {pipeline_mode = #tpu.pipeline_mode<synchronous>, transform_indices = @transform_22, window_bounds = array<i64: 2, 1, 32>}, {pipeline_mode = #tpu.pipeline_mode<synchronous>, transform_indices = @transform_23, window_bounds = array<i64: 32, 128>}, {pipeline_mode = #tpu.pipeline_mode<synchronous>, transform_indices = @transform_24, window_bounds = array<i64: 1, 128>}, {transform_indices = @transform_25, window_bounds = array<i64: 1, 8, 128>}]} {
    %0 = tpu.iota {dimensions = array<i32: 0>} : vector<8x8xi32>
    %1 = tpu.iota {dimensions = array<i32: 1>} : vector<8x8xi32>
    %2 = arith.cmpi sge, %0, %1 : vector<8x8xi32>
    %cst = arith.constant 0.000000e+00 : f32
    %cst_0 = arith.constant -1.000000e+30 : f32
    %3 = vector.broadcast %cst : f32 to vector<8x8xf32>
    %4 = vector.broadcast %cst_0 : f32 to vector<8x8xf32>
    %5 = arith.select %2, %3, %4 : vector<8x8xi1>, vector<8x8xf32>
    %c0_i32 = arith.constant 0 : i32
    %6 = arith.cmpi eq, %arg1, %c0_i32 : i32
    %7 = arith.extui %6 : i1 to i32
    %c0_i32_1 = arith.constant 0 : i32
    %8 = arith.cmpi ne, %7, %c0_i32_1 : i32
    scf.if %8 {
      %c0_138 = arith.constant 0 : index
      %c0_139 = arith.constant 0 : index
      %c0_140 = arith.constant 0 : index
      %249 = vector.load %arg4[%c0_138, %c0_139, %c0_140] : memref<1x8x32xf32, #tpu.memory_space<vmem>>, vector<1x8x32xf32>
      %250 = vector.shape_cast %249 : vector<1x8x32xf32> to vector<8x32xf32>
      %c0_141 = arith.constant 0 : index
      %c0_142 = arith.constant 0 : index
      %c0_143 = arith.constant 0 : index
      %251 = vector.load %arg2[%c0_141, %c0_142, %c0_143] : memref<1x8x128xf32, #tpu.memory_space<vmem>>, vector<1x8x128xf32>
      %252 = vector.shape_cast %251 : vector<1x8x128xf32> to vector<8x128xf32>
      %c0_144 = arith.constant 0 : index
      %c0_145 = arith.constant 0 : index
      %253 = vector.load %arg5[%c0_144, %c0_145] : memref<128x32xbf16, #tpu.memory_space<vmem>>, vector<128x32xbf16>
      %c0_146 = arith.constant 0 : index
      %c0_147 = arith.constant 0 : index
      %254 = vector.load %arg6[%c0_146, %c0_147] : memref<1x32xf32, #tpu.memory_space<vmem>>, vector<1x32xf32>
      %255 = arith.truncf %252 : vector<8x128xf32> to vector<8x128xbf16>
      %cst_148 = arith.constant dense<0.000000e+00> : vector<8x32xf32>
      %256 = tpu.matmul %255, %253, %cst_148 {dimension_numbers = #tpu.dot_dimension_numbers<[1], [0], [0], [1], [0, 0, 1, 1], [], []>} : vector<8x128xbf16>, vector<128x32xbf16>, vector<8x32xf32> -> vector<8x32xf32>
      %257 = vector.broadcast %254 : vector<1x32xf32> to vector<8x32xf32>
      %258 = arith.addf %256, %257 : vector<8x32xf32>
      %259 = arith.addf %250, %258 : vector<8x32xf32>
      %260 = arith.negf %259 : vector<8x32xf32>
      %261 = math.exp %260 : vector<8x32xf32>
      %cst_149 = arith.constant 1.000000e+00 : f32
      %262 = vector.broadcast %cst_149 : f32 to vector<8x32xf32>
      %263 = arith.addf %262, %261 : vector<8x32xf32>
      %264 = arith.divf %262, %263 : vector<8x32xf32>
      %265 = arith.mulf %259, %264 : vector<8x32xf32>
      %266 = arith.truncf %265 : vector<8x32xf32> to vector<8x32xbf16>
      %c0_150 = arith.constant 0 : index
      %c0_151 = arith.constant 0 : index
      %267 = vector.load %arg29[%c0_150, %c0_151] : memref<8x32xbf16, #tpu.memory_space<vmem>>, vector<8x32xbf16>
      tpu.vector_store %arg29[%c0_150, %c0_151], %266 {strides = array<i32>} : memref<8x32xbf16, #tpu.memory_space<vmem>>, vector<8x32xbf16>,
      %c0_152 = arith.constant 0 : index
      %c0_153 = arith.constant 0 : index
      %c0_154 = arith.constant 0 : index
      %268 = vector.load %arg3[%c0_152, %c0_153, %c0_154] : memref<1x8x128xf32, #tpu.memory_space<vmem>>, vector<1x8x128xf32>
      %269 = vector.shape_cast %268 : vector<1x8x128xf32> to vector<8x128xf32>
      %c0_155 = arith.constant 0 : index
      %c0_156 = arith.constant 0 : index
      %270 = vector.load %arg7[%c0_155, %c0_156] : memref<128x32xbf16, #tpu.memory_space<vmem>>, vector<128x32xbf16>
      %c0_157 = arith.constant 0 : index
      %c0_158 = arith.constant 0 : index
      %271 = vector.load %arg8[%c0_157, %c0_158] : memref<1x32xf32, #tpu.memory_space<vmem>>, vector<1x32xf32>
      %272 = arith.truncf %269 : vector<8x128xf32> to vector<8x128xbf16>
      %cst_159 = arith.constant dense<0.000000e+00> : vector<8x32xf32>
      %273 = tpu.matmul %272, %270, %cst_159 {dimension_numbers = #tpu.dot_dimension_numbers<[1], [0], [0], [1], [0, 0, 1, 1], [], []>} : vector<8x128xbf16>, vector<128x32xbf16>, vector<8x32xf32> -> vector<8x32xf32>
      %274 = vector.broadcast %271 : vector<1x32xf32> to vector<8x32xf32>
      %275 = arith.addf %273, %274 : vector<8x32xf32>
      %cst_160 = arith.constant 5.000000e-01 : f32
      %276 = vector.broadcast %cst_160 : f32 to vector<8x32xf32>
      %277 = arith.mulf %276, %275 : vector<8x32xf32>
      %cst_161 = arith.constant 0.707106769 : f32
      %278 = vector.broadcast %cst_161 : f32 to vector<8x32xf32>
      %279 = arith.mulf %275, %278 : vector<8x32xf32>
      %280 = math.erf %279 : vector<8x32xf32>
      %cst_162 = arith.constant 1.000000e+00 : f32
      %281 = vector.broadcast %cst_162 : f32 to vector<8x32xf32>
      %282 = arith.addf %281, %280 : vector<8x32xf32>
      %283 = arith.mulf %277, %282 : vector<8x32xf32>
      %c0_163 = arith.constant 0 : index
      %c0_164 = arith.constant 0 : index
      %284 = vector.load %arg28[%c0_163, %c0_164] : memref<8x32xf32, #tpu.memory_space<vmem>>, vector<8x32xf32>
      tpu.vector_store %arg28[%c0_163, %c0_164], %283 {strides = array<i32>} : memref<8x32xf32, #tpu.memory_space<vmem>>, vector<8x32xf32>,
    } else {
    }
    %c0 = arith.constant 0 : index
    %c0_2 = arith.constant 0 : index
    %9 = vector.load %arg29[%c0, %c0_2] : memref<8x32xbf16, #tpu.memory_space<vmem>>, vector<8x32xbf16>
    %c0_3 = arith.constant 0 : index
    %c0_4 = arith.constant 0 : index
    %10 = vector.load %arg28[%c0_3, %c0_4] : memref<8x32xf32, #tpu.memory_space<vmem>>, vector<8x32xf32>
    %c0_5 = arith.constant 0 : index
    %c0_6 = arith.constant 0 : index
    %c0_7 = arith.constant 0 : index
    %c0_8 = arith.constant 0 : index
    %11 = vector.load %arg9[%c0_5, %c0_6, %c0_7, %c0_8] : memref<1x6x32x32xbf16, #tpu.memory_space<vmem>>, vector<1x1x32x32xbf16>
    %12 = vector.shape_cast %11 : vector<1x1x32x32xbf16> to vector<32x32xbf16>
    %cst_9 = arith.constant dense<0.000000e+00> : vector<8x32xf32>
    %13 = tpu.matmul %9, %12, %cst_9 {dimension_numbers = #tpu.dot_dimension_numbers<[1], [0], [0], [1], [0, 0, 1, 1], [], []>} : vector<8x32xbf16>, vector<32x32xbf16>, vector<8x32xf32> -> vector<8x32xf32>
    %c0_10 = arith.constant 0 : index
    %c0_11 = arith.constant 0 : index
    %c0_12 = arith.constant 0 : index
    %c0_13 = arith.constant 0 : index
    %14 = vector.load %arg10[%c0_10, %c0_11, %c0_12, %c0_13] : memref<1x6x1x32xf32, #tpu.memory_space<vmem>>, vector<1x1x1x32xf32>
    %15 = vector.shape_cast %14 : vector<1x1x1x32xf32> to vector<1x32xf32>
    %16 = vector.broadcast %15 : vector<1x32xf32> to vector<8x32xf32>
    %17 = arith.addf %13, %16 : vector<8x32xf32>
    %c0_14 = arith.constant 0 : index
    %c1 = arith.constant 1 : index
    %c0_15 = arith.constant 0 : index
    %c0_16 = arith.constant 0 : index
    %18 = vector.load %arg9[%c0_14, %c1, %c0_15, %c0_16] : memref<1x6x32x32xbf16, #tpu.memory_space<vmem>>, vector<1x1x32x32xbf16>
    %19 = vector.shape_cast %18 : vector<1x1x32x32xbf16> to vector<32x32xbf16>
    %cst_17 = arith.constant dense<0.000000e+00> : vector<8x32xf32>
    %20 = tpu.matmul %9, %19, %cst_17 {dimension_numbers = #tpu.dot_dimension_numbers<[1], [0], [0], [1], [0, 0, 1, 1], [], []>} : vector<8x32xbf16>, vector<32x32xbf16>, vector<8x32xf32> -> vector<8x32xf32>
    %c0_18 = arith.constant 0 : index
    %c1_19 = arith.constant 1 : index
    %c0_20 = arith.constant 0 : index
    %c0_21 = arith.constant 0 : index
    %21 = vector.load %arg10[%c0_18, %c1_19, %c0_20, %c0_21] : memref<1x6x1x32xf32, #tpu.memory_space<vmem>>, vector<1x1x1x32xf32>
    %22 = vector.shape_cast %21 : vector<1x1x1x32xf32> to vector<1x32xf32>
    %23 = vector.broadcast %22 : vector<1x32xf32> to vector<8x32xf32>
    %24 = arith.addf %20, %23 : vector<8x32xf32>
    %c0_22 = arith.constant 0 : index
    %c2 = arith.constant 2 : index
    %c0_23 = arith.constant 0 : index
    %c0_24 = arith.constant 0 : index
    %25 = vector.load %arg9[%c0_22, %c2, %c0_23, %c0_24] : memref<1x6x32x32xbf16, #tpu.memory_space<vmem>>, vector<1x1x32x32xbf16>
    %26 = vector.shape_cast %25 : vector<1x1x32x32xbf16> to vector<32x32xbf16>
    %cst_25 = arith.constant dense<0.000000e+00> : vector<8x32xf32>
    %27 = tpu.matmul %9, %26, %cst_25 {dimension_numbers = #tpu.dot_dimension_numbers<[1], [0], [0], [1], [0, 0, 1, 1], [], []>} : vector<8x32xbf16>, vector<32x32xbf16>, vector<8x32xf32> -> vector<8x32xf32>
    %c0_26 = arith.constant 0 : index
    %c2_27 = arith.constant 2 : index
    %c0_28 = arith.constant 0 : index
    %c0_29 = arith.constant 0 : index
    %28 = vector.load %arg10[%c0_26, %c2_27, %c0_28, %c0_29] : memref<1x6x1x32xf32, #tpu.memory_space<vmem>>, vector<1x1x1x32xf32>
    %29 = vector.shape_cast %28 : vector<1x1x1x32xf32> to vector<1x32xf32>
    %30 = vector.broadcast %29 : vector<1x32xf32> to vector<8x32xf32>
    %31 = arith.addf %27, %30 : vector<8x32xf32>
    %c0_30 = arith.constant 0 : index
    %c3 = arith.constant 3 : index
    %c0_31 = arith.constant 0 : index
    %c0_32 = arith.constant 0 : index
    %32 = vector.load %arg9[%c0_30, %c3, %c0_31, %c0_32] : memref<1x6x32x32xbf16, #tpu.memory_space<vmem>>, vector<1x1x32x32xbf16>
    %33 = vector.shape_cast %32 : vector<1x1x32x32xbf16> to vector<32x32xbf16>
    %cst_33 = arith.constant dense<0.000000e+00> : vector<8x32xf32>
    %34 = tpu.matmul %9, %33, %cst_33 {dimension_numbers = #tpu.dot_dimension_numbers<[1], [0], [0], [1], [0, 0, 1, 1], [], []>} : vector<8x32xbf16>, vector<32x32xbf16>, vector<8x32xf32> -> vector<8x32xf32>
    %c0_34 = arith.constant 0 : index
    %c3_35 = arith.constant 3 : index
    %c0_36 = arith.constant 0 : index
    %c0_37 = arith.constant 0 : index
    %35 = vector.load %arg10[%c0_34, %c3_35, %c0_36, %c0_37] : memref<1x6x1x32xf32, #tpu.memory_space<vmem>>, vector<1x1x1x32xf32>
    %36 = vector.shape_cast %35 : vector<1x1x1x32xf32> to vector<1x32xf32>
    %37 = vector.broadcast %36 : vector<1x32xf32> to vector<8x32xf32>
    %38 = arith.addf %34, %37 : vector<8x32xf32>
    %c0_38 = arith.constant 0 : index
    %c4 = arith.constant 4 : index
    %c0_39 = arith.constant 0 : index
    %c0_40 = arith.constant 0 : index
    %39 = vector.load %arg9[%c0_38, %c4, %c0_39, %c0_40] : memref<1x6x32x32xbf16, #tpu.memory_space<vmem>>, vector<1x1x32x32xbf16>
    %40 = vector.shape_cast %39 : vector<1x1x32x32xbf16> to vector<32x32xbf16>
    %cst_41 = arith.constant dense<0.000000e+00> : vector<8x32xf32>
    %41 = tpu.matmul %9, %40, %cst_41 {dimension_numbers = #tpu.dot_dimension_numbers<[1], [0], [0], [1], [0, 0, 1, 1], [], []>} : vector<8x32xbf16>, vector<32x32xbf16>, vector<8x32xf32> -> vector<8x32xf32>
    %c0_42 = arith.constant 0 : index
    %c4_43 = arith.constant 4 : index
    %c0_44 = arith.constant 0 : index
    %c0_45 = arith.constant 0 : index
    %42 = vector.load %arg10[%c0_42, %c4_43, %c0_44, %c0_45] : memref<1x6x1x32xf32, #tpu.memory_space<vmem>>, vector<1x1x1x32xf32>
    %43 = vector.shape_cast %42 : vector<1x1x1x32xf32> to vector<1x32xf32>
    %44 = vector.broadcast %43 : vector<1x32xf32> to vector<8x32xf32>
    %45 = arith.addf %41, %44 : vector<8x32xf32>
    %c0_46 = arith.constant 0 : index
    %c5 = arith.constant 5 : index
    %c0_47 = arith.constant 0 : index
    %c0_48 = arith.constant 0 : index
    %46 = vector.load %arg9[%c0_46, %c5, %c0_47, %c0_48] : memref<1x6x32x32xbf16, #tpu.memory_space<vmem>>, vector<1x1x32x32xbf16>
    %47 = vector.shape_cast %46 : vector<1x1x32x32xbf16> to vector<32x32xbf16>
    %cst_49 = arith.constant dense<0.000000e+00> : vector<8x32xf32>
    %48 = tpu.matmul %9, %47, %cst_49 {dimension_numbers = #tpu.dot_dimension_numbers<[1], [0], [0], [1], [0, 0, 1, 1], [], []>} : vector<8x32xbf16>, vector<32x32xbf16>, vector<8x32xf32> -> vector<8x32xf32>
    %c0_50 = arith.constant 0 : index
    %c5_51 = arith.constant 5 : index
    %c0_52 = arith.constant 0 : index
    %c0_53 = arith.constant 0 : index
    %49 = vector.load %arg10[%c0_50, %c5_51, %c0_52, %c0_53] : memref<1x6x1x32xf32, #tpu.memory_space<vmem>>, vector<1x1x1x32xf32>
    %50 = vector.shape_cast %49 : vector<1x1x1x32xf32> to vector<1x32xf32>
    %51 = vector.broadcast %50 : vector<1x32xf32> to vector<8x32xf32>
    %52 = arith.addf %48, %51 : vector<8x32xf32>
    %cst_54 = arith.constant dense<0.000000e+00> : vector<8xf32>
    %53 = vector.multi_reduction <add>, %10, %cst_54 [1] : vector<8x32xf32> to vector<8xf32>
    %54 = vector.shape_cast %53 : vector<8xf32> to vector<8x1xf32>
    %cst_55 = arith.constant 3.200000e+01 : f32
    %55 = vector.broadcast %cst_55 : f32 to vector<8x1xf32>
    %56 = arith.divf %54, %55 : vector<8x1xf32>
    %57 = vector.broadcast %56 : vector<8x1xf32> to vector<8x32xf32>
    %58 = arith.subf %10, %57 : vector<8x32xf32>
    %59 = arith.mulf %58, %58 : vector<8x32xf32>
    %cst_56 = arith.constant dense<0.000000e+00> : vector<8xf32>
    %60 = vector.multi_reduction <add>, %59, %cst_56 [1] : vector<8x32xf32> to vector<8xf32>
    %61 = vector.shape_cast %60 : vector<8xf32> to vector<8x1xf32>
    %cst_57 = arith.constant 3.200000e+01 : f32
    %62 = vector.broadcast %cst_57 : f32 to vector<8x1xf32>
    %63 = arith.divf %61, %62 : vector<8x1xf32>
    %cst_58 = arith.constant 9.99999997E-7 : f32
    %64 = vector.broadcast %cst_58 : f32 to vector<8x1xf32>
    %65 = arith.addf %63, %64 : vector<8x1xf32>
    %66 = math.rsqrt %65 : vector<8x1xf32>
    %67 = vector.broadcast %66 : vector<8x1xf32> to vector<8x32xf32>
    %68 = arith.mulf %58, %67 : vector<8x32xf32>
    %cst_59 = arith.constant 1.000000e+00 : f32
    %69 = vector.broadcast %cst_59 : f32 to vector<8x32xf32>
    %70 = arith.addf %69, %24 : vector<8x32xf32>
    %71 = arith.mulf %68, %70 : vector<8x32xf32>
    %72 = arith.addf %71, %17 : vector<8x32xf32>
    %73 = arith.truncf %72 : vector<8x32xf32> to vector<8x32xbf16>
    %c0_60 = arith.constant 0 : index
    %c0_61 = arith.constant 0 : index
    %c0_62 = arith.constant 0 : index
    %74 = vector.load %arg11[%c0_60, %c0_61, %c0_62] : memref<1x32x32xbf16, #tpu.memory_space<vmem>>, vector<1x32x32xbf16>
    %75 = vector.shape_cast %74 : vector<1x32x32xbf16> to vector<32x32xbf16>
    %cst_63 = arith.constant dense<0.000000e+00> : vector<8x32xf32>
    %76 = tpu.matmul %73, %75, %cst_63 {dimension_numbers = #tpu.dot_dimension_numbers<[1], [0], [0], [1], [0, 0, 1, 1], [], []>} : vector<8x32xbf16>, vector<32x32xbf16>, vector<8x32xf32> -> vector<8x32xf32>
    %c0_64 = arith.constant 0 : index
    %c0_65 = arith.constant 0 : index
    %c0_66 = arith.constant 0 : index
    %77 = vector.load %arg12[%c0_64, %c0_65, %c0_66] : memref<1x1x32xf32, #tpu.memory_space<vmem>>, vector<1x1x32xf32>
    %78 = vector.shape_cast %77 : vector<1x1x32xf32> to vector<1x32xf32>
    %79 = vector.broadcast %78 : vector<1x32xf32> to vector<8x32xf32>
    %80 = arith.addf %76, %79 : vector<8x32xf32>
    %81 = arith.truncf %80 : vector<8x32xf32> to vector<8x32xbf16>
    %c0_67 = arith.constant 0 : index
    %c0_68 = arith.constant 0 : index
    %c0_69 = arith.constant 0 : index
    %82 = vector.load %arg13[%c0_67, %c0_68, %c0_69] : memref<1x32x32xbf16, #tpu.memory_space<vmem>>, vector<1x32x32xbf16>
    %83 = vector.shape_cast %82 : vector<1x32x32xbf16> to vector<32x32xbf16>
    %cst_70 = arith.constant dense<0.000000e+00> : vector<8x32xf32>
    %84 = tpu.matmul %73, %83, %cst_70 {dimension_numbers = #tpu.dot_dimension_numbers<[1], [0], [0], [1], [0, 0, 1, 1], [], []>} : vector<8x32xbf16>, vector<32x32xbf16>, vector<8x32xf32> -> vector<8x32xf32>
    %c0_71 = arith.constant 0 : index
    %c0_72 = arith.constant 0 : index
    %c0_73 = arith.constant 0 : index
    %85 = vector.load %arg14[%c0_71, %c0_72, %c0_73] : memref<1x1x32xf32, #tpu.memory_space<vmem>>, vector<1x1x32xf32>
    %86 = vector.shape_cast %85 : vector<1x1x32xf32> to vector<1x32xf32>
    %87 = vector.broadcast %86 : vector<1x32xf32> to vector<8x32xf32>
    %88 = arith.addf %84, %87 : vector<8x32xf32>
    %89 = arith.truncf %88 : vector<8x32xf32> to vector<8x32xbf16>
    %c0_74 = arith.constant 0 : index
    %c0_75 = arith.constant 0 : index
    %c0_76 = arith.constant 0 : index
    %90 = vector.load %arg15[%c0_74, %c0_75, %c0_76] : memref<1x32x32xbf16, #tpu.memory_space<vmem>>, vector<1x32x32xbf16>
    %91 = vector.shape_cast %90 : vector<1x32x32xbf16> to vector<32x32xbf16>
    %cst_77 = arith.constant dense<0.000000e+00> : vector<8x32xf32>
    %92 = tpu.matmul %73, %91, %cst_77 {dimension_numbers = #tpu.dot_dimension_numbers<[1], [0], [0], [1], [0, 0, 1, 1], [], []>} : vector<8x32xbf16>, vector<32x32xbf16>, vector<8x32xf32> -> vector<8x32xf32>
    %c0_78 = arith.constant 0 : index
    %c0_79 = arith.constant 0 : index
    %c0_80 = arith.constant 0 : index
    %93 = vector.load %arg16[%c0_78, %c0_79, %c0_80] : memref<1x1x32xf32, #tpu.memory_space<vmem>>, vector<1x1x32xf32>
    %94 = vector.shape_cast %93 : vector<1x1x32xf32> to vector<1x32xf32>
    %95 = vector.broadcast %94 : vector<1x32xf32> to vector<8x32xf32>
    %96 = arith.addf %92, %95 : vector<8x32xf32>
    %97 = arith.truncf %96 : vector<8x32xf32> to vector<8x32xbf16>
    %c0_81 = arith.constant 0 : index
    %c0_82 = arith.constant 0 : index
    %c0_83 = arith.constant 0 : index
    %98 = vector.load %arg17[%c0_81, %c0_82, %c0_83] : memref<1x32x32xbf16, #tpu.memory_space<vmem>>, vector<1x32x32xbf16>
    %99 = vector.shape_cast %98 : vector<1x32x32xbf16> to vector<32x32xbf16>
    %cst_84 = arith.constant 0.000000e+00 : f32
    %100 = vector.broadcast %cst_84 : f32 to vector<8x32xf32>
    %101 = vector.extract_strided_slice %81 {offsets = [0, 0], sizes = [8, 8], strides = [1, 1]} : vector<8x32xbf16> to vector<8x8xbf16>
    %102 = vector.extract_strided_slice %89 {offsets = [0, 0], sizes = [8, 8], strides = [1, 1]} : vector<8x32xbf16> to vector<8x8xbf16>
    %cst_85 = arith.constant dense<0.000000e+00> : vector<8x8xf32>
    %103 = tpu.matmul %101, %102, %cst_85 {dimension_numbers = #tpu.dot_dimension_numbers<[1], [1], [0], [0], [0, 0, 1, 0], [], []>} : vector<8x8xbf16>, vector<8x8xbf16>, vector<8x8xf32> -> vector<8x8xf32>
    %cst_86 = arith.constant 0.353553385 : f32
    %104 = vector.broadcast %cst_86 : f32 to vector<8x8xf32>
    %105 = arith.mulf %103, %104 : vector<8x8xf32>
    %106 = arith.addf %105, %5 : vector<8x8xf32>
    %cst_87 = arith.constant dense<0xFF800000> : vector<8xf32>
    %107 = vector.multi_reduction <maximumf>, %106, %cst_87 [1] : vector<8x8xf32> to vector<8xf32>
    %108 = vector.shape_cast %107 : vector<8xf32> to vector<8x1xf32>
    %109 = vector.broadcast %108 : vector<8x1xf32> to vector<8x8xf32>
    %110 = arith.subf %106, %109 : vector<8x8xf32>
    %111 = math.exp %110 : vector<8x8xf32>
    %cst_88 = arith.constant dense<0.000000e+00> : vector<8xf32>
    %112 = vector.multi_reduction <add>, %111, %cst_88 [1] : vector<8x8xf32> to vector<8xf32>
    %113 = vector.shape_cast %112 : vector<8xf32> to vector<8x1xf32>
    %114 = tpu.reciprocal %113 {approx = true} : vector<8x1xf32> -> vector<8x1xf32>
    %115 = vector.broadcast %114 : vector<8x1xf32> to vector<8x8xf32>
    %116 = arith.mulf %111, %115 : vector<8x8xf32>
    %117 = arith.truncf %116 : vector<8x8xf32> to vector<8x8xbf16>
    %118 = vector.extract_strided_slice %97 {offsets = [0, 0], sizes = [8, 8], strides = [1, 1]} : vector<8x32xbf16> to vector<8x8xbf16>
    %cst_89 = arith.constant dense<0.000000e+00> : vector<8x8xf32>
    %119 = tpu.matmul %117, %118, %cst_89 {dimension_numbers = #tpu.dot_dimension_numbers<[1], [0], [0], [1], [0, 0, 1, 1], [], []>} : vector<8x8xbf16>, vector<8x8xbf16>, vector<8x8xf32> -> vector<8x8xf32>
    %120 = arith.truncf %119 : vector<8x8xf32> to vector<8x8xbf16>
    %121 = vector.extract_strided_slice %99 {offsets = [0, 0], sizes = [8, 32], strides = [1, 1]} : vector<32x32xbf16> to vector<8x32xbf16>
    %cst_90 = arith.constant dense<0.000000e+00> : vector<8x32xf32>
    %122 = tpu.matmul %120, %121, %cst_90 {dimension_numbers = #tpu.dot_dimension_numbers<[1], [0], [0], [1], [0, 0, 1, 1], [], []>} : vector<8x8xbf16>, vector<8x32xbf16>, vector<8x32xf32> -> vector<8x32xf32>
    %123 = arith.addf %100, %122 : vector<8x32xf32>
    %124 = vector.extract_strided_slice %81 {offsets = [0, 8], sizes = [8, 8], strides = [1, 1]} : vector<8x32xbf16> to vector<8x8xbf16>
    %125 = vector.extract_strided_slice %89 {offsets = [0, 8], sizes = [8, 8], strides = [1, 1]} : vector<8x32xbf16> to vector<8x8xbf16>
    %cst_91 = arith.constant dense<0.000000e+00> : vector<8x8xf32>
    %126 = tpu.matmul %124, %125, %cst_91 {dimension_numbers = #tpu.dot_dimension_numbers<[1], [1], [0], [0], [0, 0, 1, 0], [], []>} : vector<8x8xbf16>, vector<8x8xbf16>, vector<8x8xf32> -> vector<8x8xf32>
    %cst_92 = arith.constant 0.353553385 : f32
    %127 = vector.broadcast %cst_92 : f32 to vector<8x8xf32>
    %128 = arith.mulf %126, %127 : vector<8x8xf32>
    %129 = arith.addf %128, %5 : vector<8x8xf32>
    %cst_93 = arith.constant dense<0xFF800000> : vector<8xf32>
    %130 = vector.multi_reduction <maximumf>, %129, %cst_93 [1] : vector<8x8xf32> to vector<8xf32>
    %131 = vector.shape_cast %130 : vector<8xf32> to vector<8x1xf32>
    %132 = vector.broadcast %131 : vector<8x1xf32> to vector<8x8xf32>
    %133 = arith.subf %129, %132 : vector<8x8xf32>
    %134 = math.exp %133 : vector<8x8xf32>
    %cst_94 = arith.constant dense<0.000000e+00> : vector<8xf32>
    %135 = vector.multi_reduction <add>, %134, %cst_94 [1] : vector<8x8xf32> to vector<8xf32>
    %136 = vector.shape_cast %135 : vector<8xf32> to vector<8x1xf32>
    %137 = tpu.reciprocal %136 {approx = true} : vector<8x1xf32> -> vector<8x1xf32>
    %138 = vector.broadcast %137 : vector<8x1xf32> to vector<8x8xf32>
    %139 = arith.mulf %134, %138 : vector<8x8xf32>
    %140 = arith.truncf %139 : vector<8x8xf32> to vector<8x8xbf16>
    %141 = vector.extract_strided_slice %97 {offsets = [0, 8], sizes = [8, 8], strides = [1, 1]} : vector<8x32xbf16> to vector<8x8xbf16>
    %cst_95 = arith.constant dense<0.000000e+00> : vector<8x8xf32>
    %142 = tpu.matmul %140, %141, %cst_95 {dimension_numbers = #tpu.dot_dimension_numbers<[1], [0], [0], [1], [0, 0, 1, 1], [], []>} : vector<8x8xbf16>, vector<8x8xbf16>, vector<8x8xf32> -> vector<8x8xf32>
    %143 = arith.truncf %142 : vector<8x8xf32> to vector<8x8xbf16>
    %144 = vector.extract_strided_slice %99 {offsets = [8, 0], sizes = [8, 32], strides = [1, 1]} : vector<32x32xbf16> to vector<8x32xbf16>
    %cst_96 = arith.constant dense<0.000000e+00> : vector<8x32xf32>
    %145 = tpu.matmul %143, %144, %cst_96 {dimension_numbers = #tpu.dot_dimension_numbers<[1], [0], [0], [1], [0, 0, 1, 1], [], []>} : vector<8x8xbf16>, vector<8x32xbf16>, vector<8x32xf32> -> vector<8x32xf32>
    %146 = arith.addf %123, %145 : vector<8x32xf32>
    %147 = vector.extract_strided_slice %81 {offsets = [0, 16], sizes = [8, 8], strides = [1, 1]} : vector<8x32xbf16> to vector<8x8xbf16>
    %148 = vector.extract_strided_slice %89 {offsets = [0, 16], sizes = [8, 8], strides = [1, 1]} : vector<8x32xbf16> to vector<8x8xbf16>
    %cst_97 = arith.constant dense<0.000000e+00> : vector<8x8xf32>
    %149 = tpu.matmul %147, %148, %cst_97 {dimension_numbers = #tpu.dot_dimension_numbers<[1], [1], [0], [0], [0, 0, 1, 0], [], []>} : vector<8x8xbf16>, vector<8x8xbf16>, vector<8x8xf32> -> vector<8x8xf32>
    %cst_98 = arith.constant 0.353553385 : f32
    %150 = vector.broadcast %cst_98 : f32 to vector<8x8xf32>
    %151 = arith.mulf %149, %150 : vector<8x8xf32>
    %152 = arith.addf %151, %5 : vector<8x8xf32>
    %cst_99 = arith.constant dense<0xFF800000> : vector<8xf32>
    %153 = vector.multi_reduction <maximumf>, %152, %cst_99 [1] : vector<8x8xf32> to vector<8xf32>
    %154 = vector.shape_cast %153 : vector<8xf32> to vector<8x1xf32>
    %155 = vector.broadcast %154 : vector<8x1xf32> to vector<8x8xf32>
    %156 = arith.subf %152, %155 : vector<8x8xf32>
    %157 = math.exp %156 : vector<8x8xf32>
    %cst_100 = arith.constant dense<0.000000e+00> : vector<8xf32>
    %158 = vector.multi_reduction <add>, %157, %cst_100 [1] : vector<8x8xf32> to vector<8xf32>
    %159 = vector.shape_cast %158 : vector<8xf32> to vector<8x1xf32>
    %160 = tpu.reciprocal %159 {approx = true} : vector<8x1xf32> -> vector<8x1xf32>
    %161 = vector.broadcast %160 : vector<8x1xf32> to vector<8x8xf32>
    %162 = arith.mulf %157, %161 : vector<8x8xf32>
    %163 = arith.truncf %162 : vector<8x8xf32> to vector<8x8xbf16>
    %164 = vector.extract_strided_slice %97 {offsets = [0, 16], sizes = [8, 8], strides = [1, 1]} : vector<8x32xbf16> to vector<8x8xbf16>
    %cst_101 = arith.constant dense<0.000000e+00> : vector<8x8xf32>
    %165 = tpu.matmul %163, %164, %cst_101 {dimension_numbers = #tpu.dot_dimension_numbers<[1], [0], [0], [1], [0, 0, 1, 1], [], []>} : vector<8x8xbf16>, vector<8x8xbf16>, vector<8x8xf32> -> vector<8x8xf32>
    %166 = arith.truncf %165 : vector<8x8xf32> to vector<8x8xbf16>
    %167 = vector.extract_strided_slice %99 {offsets = [16, 0], sizes = [8, 32], strides = [1, 1]} : vector<32x32xbf16> to vector<8x32xbf16>
    %cst_102 = arith.constant dense<0.000000e+00> : vector<8x32xf32>
    %168 = tpu.matmul %166, %167, %cst_102 {dimension_numbers = #tpu.dot_dimension_numbers<[1], [0], [0], [1], [0, 0, 1, 1], [], []>} : vector<8x8xbf16>, vector<8x32xbf16>, vector<8x32xf32> -> vector<8x32xf32>
    %169 = arith.addf %146, %168 : vector<8x32xf32>
    %170 = vector.extract_strided_slice %81 {offsets = [0, 24], sizes = [8, 8], strides = [1, 1]} : vector<8x32xbf16> to vector<8x8xbf16>
    %171 = vector.extract_strided_slice %89 {offsets = [0, 24], sizes = [8, 8], strides = [1, 1]} : vector<8x32xbf16> to vector<8x8xbf16>
    %cst_103 = arith.constant dense<0.000000e+00> : vector<8x8xf32>
    %172 = tpu.matmul %170, %171, %cst_103 {dimension_numbers = #tpu.dot_dimension_numbers<[1], [1], [0], [0], [0, 0, 1, 0], [], []>} : vector<8x8xbf16>, vector<8x8xbf16>, vector<8x8xf32> -> vector<8x8xf32>
    %cst_104 = arith.constant 0.353553385 : f32
    %173 = vector.broadcast %cst_104 : f32 to vector<8x8xf32>
    %174 = arith.mulf %172, %173 : vector<8x8xf32>
    %175 = arith.addf %174, %5 : vector<8x8xf32>
    %cst_105 = arith.constant dense<0xFF800000> : vector<8xf32>
    %176 = vector.multi_reduction <maximumf>, %175, %cst_105 [1] : vector<8x8xf32> to vector<8xf32>
    %177 = vector.shape_cast %176 : vector<8xf32> to vector<8x1xf32>
    %178 = vector.broadcast %177 : vector<8x1xf32> to vector<8x8xf32>
    %179 = arith.subf %175, %178 : vector<8x8xf32>
    %180 = math.exp %179 : vector<8x8xf32>
    %cst_106 = arith.constant dense<0.000000e+00> : vector<8xf32>
    %181 = vector.multi_reduction <add>, %180, %cst_106 [1] : vector<8x8xf32> to vector<8xf32>
    %182 = vector.shape_cast %181 : vector<8xf32> to vector<8x1xf32>
    %183 = tpu.reciprocal %182 {approx = true} : vector<8x1xf32> -> vector<8x1xf32>
    %184 = vector.broadcast %183 : vector<8x1xf32> to vector<8x8xf32>
    %185 = arith.mulf %180, %184 : vector<8x8xf32>
    %186 = arith.truncf %185 : vector<8x8xf32> to vector<8x8xbf16>
    %187 = vector.extract_strided_slice %97 {offsets = [0, 24], sizes = [8, 8], strides = [1, 1]} : vector<8x32xbf16> to vector<8x8xbf16>
    %cst_107 = arith.constant dense<0.000000e+00> : vector<8x8xf32>
    %188 = tpu.matmul %186, %187, %cst_107 {dimension_numbers = #tpu.dot_dimension_numbers<[1], [0], [0], [1], [0, 0, 1, 1], [], []>} : vector<8x8xbf16>, vector<8x8xbf16>, vector<8x8xf32> -> vector<8x8xf32>
    %189 = arith.truncf %188 : vector<8x8xf32> to vector<8x8xbf16>
    %190 = vector.extract_strided_slice %99 {offsets = [24, 0], sizes = [8, 32], strides = [1, 1]} : vector<32x32xbf16> to vector<8x32xbf16>
    %cst_108 = arith.constant dense<0.000000e+00> : vector<8x32xf32>
    %191 = tpu.matmul %189, %190, %cst_108 {dimension_numbers = #tpu.dot_dimension_numbers<[1], [0], [0], [1], [0, 0, 1, 1], [], []>} : vector<8x8xbf16>, vector<8x32xbf16>, vector<8x32xf32> -> vector<8x32xf32>
    %192 = arith.addf %169, %191 : vector<8x32xf32>
    %c0_109 = arith.constant 0 : index
    %c0_110 = arith.constant 0 : index
    %c0_111 = arith.constant 0 : index
    %193 = vector.load %arg18[%c0_109, %c0_110, %c0_111] : memref<1x1x32xf32, #tpu.memory_space<vmem>>, vector<1x1x32xf32>
    %194 = vector.shape_cast %193 : vector<1x1x32xf32> to vector<1x32xf32>
    %195 = vector.broadcast %194 : vector<1x32xf32> to vector<8x32xf32>
    %196 = arith.addf %192, %195 : vector<8x32xf32>
    %197 = arith.mulf %31, %196 : vector<8x32xf32>
    %198 = arith.addf %10, %197 : vector<8x32xf32>
    %cst_112 = arith.constant dense<0.000000e+00> : vector<8xf32>
    %199 = vector.multi_reduction <add>, %198, %cst_112 [1] : vector<8x32xf32> to vector<8xf32>
    %200 = vector.shape_cast %199 : vector<8xf32> to vector<8x1xf32>
    %cst_113 = arith.constant 3.200000e+01 : f32
    %201 = vector.broadcast %cst_113 : f32 to vector<8x1xf32>
    %202 = arith.divf %200, %201 : vector<8x1xf32>
    %203 = vector.broadcast %202 : vector<8x1xf32> to vector<8x32xf32>
    %204 = arith.subf %198, %203 : vector<8x32xf32>
    %205 = arith.mulf %204, %204 : vector<8x32xf32>
    %cst_114 = arith.constant dense<0.000000e+00> : vector<8xf32>
    %206 = vector.multi_reduction <add>, %205, %cst_114 [1] : vector<8x32xf32> to vector<8xf32>
    %207 = vector.shape_cast %206 : vector<8xf32> to vector<8x1xf32>
    %cst_115 = arith.constant 3.200000e+01 : f32
    %208 = vector.broadcast %cst_115 : f32 to vector<8x1xf32>
    %209 = arith.divf %207, %208 : vector<8x1xf32>
    %cst_116 = arith.constant 9.99999997E-7 : f32
    %210 = vector.broadcast %cst_116 : f32 to vector<8x1xf32>
    %211 = arith.addf %209, %210 : vector<8x1xf32>
    %212 = math.rsqrt %211 : vector<8x1xf32>
    %213 = vector.broadcast %212 : vector<8x1xf32> to vector<8x32xf32>
    %214 = arith.mulf %204, %213 : vector<8x32xf32>
    %cst_117 = arith.constant 1.000000e+00 : f32
    %215 = vector.broadcast %cst_117 : f32 to vector<8x32xf32>
    %216 = arith.addf %215, %45 : vector<8x32xf32>
    %217 = arith.mulf %214, %216 : vector<8x32xf32>
    %218 = arith.addf %217, %38 : vector<8x32xf32>
    %219 = arith.truncf %218 : vector<8x32xf32> to vector<8x32xbf16>
    %c0_118 = arith.constant 0 : index
    %c0_119 = arith.constant 0 : index
    %c0_120 = arith.constant 0 : index
    %220 = vector.load %arg19[%c0_118, %c0_119, %c0_120] : memref<1x32x64xbf16, #tpu.memory_space<vmem>>, vector<1x32x64xbf16>
    %221 = vector.shape_cast %220 : vector<1x32x64xbf16> to vector<32x64xbf16>
    %cst_121 = arith.constant dense<0.000000e+00> : vector<8x64xf32>
    %222 = tpu.matmul %219, %221, %cst_121 {dimension_numbers = #tpu.dot_dimension_numbers<[1], [0], [0], [1], [0, 0, 1, 1], [], []>} : vector<8x32xbf16>, vector<32x64xbf16>, vector<8x64xf32> -> vector<8x64xf32>
    %c0_122 = arith.constant 0 : index
    %c0_123 = arith.constant 0 : index
    %c0_124 = arith.constant 0 : index
    %223 = vector.load %arg20[%c0_122, %c0_123, %c0_124] : memref<1x1x64xf32, #tpu.memory_space<vmem>>, vector<1x1x64xf32>
    %224 = vector.shape_cast %223 : vector<1x1x64xf32> to vector<1x64xf32>
    %225 = vector.broadcast %224 : vector<1x64xf32> to vector<8x64xf32>
    %226 = arith.addf %222, %225 : vector<8x64xf32>
    %cst_125 = arith.constant 5.000000e-01 : f32
    %227 = vector.broadcast %cst_125 : f32 to vector<8x64xf32>
    %228 = arith.mulf %227, %226 : vector<8x64xf32>
    %cst_126 = arith.constant 0.707106769 : f32
    %229 = vector.broadcast %cst_126 : f32 to vector<8x64xf32>
    %230 = arith.mulf %226, %229 : vector<8x64xf32>
    %231 = math.erf %230 : vector<8x64xf32>
    %cst_127 = arith.constant 1.000000e+00 : f32
    %232 = vector.broadcast %cst_127 : f32 to vector<8x64xf32>
    %233 = arith.addf %232, %231 : vector<8x64xf32>
    %234 = arith.mulf %228, %233 : vector<8x64xf32>
    %235 = arith.truncf %234 : vector<8x64xf32> to vector<8x64xbf16>
    %c0_128 = arith.constant 0 : index
    %c0_129 = arith.constant 0 : index
    %c0_130 = arith.constant 0 : index
    %236 = vector.load %arg21[%c0_128, %c0_129, %c0_130] : memref<1x64x32xbf16, #tpu.memory_space<vmem>>, vector<1x64x32xbf16>
    %237 = vector.shape_cast %236 : vector<1x64x32xbf16> to vector<64x32xbf16>
    %cst_131 = arith.constant dense<0.000000e+00> : vector<8x32xf32>
    %238 = tpu.matmul %235, %237, %cst_131 {dimension_numbers = #tpu.dot_dimension_numbers<[1], [0], [0], [1], [0, 0, 1, 1], [], []>} : vector<8x64xbf16>, vector<64x32xbf16>, vector<8x32xf32> -> vector<8x32xf32>
    %c0_132 = arith.constant 0 : index
    %c0_133 = arith.constant 0 : index
    %c0_134 = arith.constant 0 : index
    %239 = vector.load %arg22[%c0_132, %c0_133, %c0_134] : memref<1x1x32xf32, #tpu.memory_space<vmem>>, vector<1x1x32xf32>
    %240 = vector.shape_cast %239 : vector<1x1x32xf32> to vector<1x32xf32>
    %241 = vector.broadcast %240 : vector<1x32xf32> to vector<8x32xf32>
    %242 = arith.addf %238, %241 : vector<8x32xf32>
    %243 = arith.mulf %52, %242 : vector<8x32xf32>
    %244 = arith.addf %198, %243 : vector<8x32xf32>
    %c0_135 = arith.constant 0 : index
    %c0_136 = arith.constant 0 : index
    %245 = vector.load %arg28[%c0_135, %c0_136] : memref<8x32xf32, #tpu.memory_space<vmem>>, vector<8x32xf32>
    tpu.vector_store %arg28[%c0_135, %c0_136], %244 {strides = array<i32>} : memref<8x32xf32, #tpu.memory_space<vmem>>, vector<8x32xf32>,
    %c1_i32 = arith.constant 1 : i32
    %246 = arith.cmpi eq, %arg1, %c1_i32 : i32
    %247 = arith.extui %246 : i1 to i32
    %c0_i32_137 = arith.constant 0 : i32
    %248 = arith.cmpi ne, %247, %c0_i32_137 : i32
    scf.if %248 {
      %c0_138 = arith.constant 0 : index
      %c0_139 = arith.constant 0 : index
      %c0_140 = arith.constant 0 : index
      %249 = vector.load %arg23[%c0_138, %c0_139, %c0_140] : memref<2x32x32xbf16, #tpu.memory_space<vmem>>, vector<1x32x32xbf16>
      %250 = vector.shape_cast %249 : vector<1x32x32xbf16> to vector<32x32xbf16>
      %cst_141 = arith.constant dense<0.000000e+00> : vector<8x32xf32>
      %251 = tpu.matmul %9, %250, %cst_141 {dimension_numbers = #tpu.dot_dimension_numbers<[1], [0], [0], [1], [0, 0, 1, 1], [], []>} : vector<8x32xbf16>, vector<32x32xbf16>, vector<8x32xf32> -> vector<8x32xf32>
      %c0_142 = arith.constant 0 : index
      %c0_143 = arith.constant 0 : index
      %c0_144 = arith.constant 0 : index
      %252 = vector.load %arg24[%c0_142, %c0_143, %c0_144] : memref<2x1x32xf32, #tpu.memory_space<vmem>>, vector<1x1x32xf32>
      %253 = vector.shape_cast %252 : vector<1x1x32xf32> to vector<1x32xf32>
      %254 = vector.broadcast %253 : vector<1x32xf32> to vector<8x32xf32>
      %255 = arith.addf %251, %254 : vector<8x32xf32>
      %c1_145 = arith.constant 1 : index
      %c0_146 = arith.constant 0 : index
      %c0_147 = arith.constant 0 : index
      %256 = vector.load %arg23[%c1_145, %c0_146, %c0_147] : memref<2x32x32xbf16, #tpu.memory_space<vmem>>, vector<1x32x32xbf16>
      %257 = vector.shape_cast %256 : vector<1x32x32xbf16> to vector<32x32xbf16>
      %cst_148 = arith.constant dense<0.000000e+00> : vector<8x32xf32>
      %258 = tpu.matmul %9, %257, %cst_148 {dimension_numbers = #tpu.dot_dimension_numbers<[1], [0], [0], [1], [0, 0, 1, 1], [], []>} : vector<8x32xbf16>, vector<32x32xbf16>, vector<8x32xf32> -> vector<8x32xf32>
      %c1_149 = arith.constant 1 : index
      %c0_150 = arith.constant 0 : index
      %c0_151 = arith.constant 0 : index
      %259 = vector.load %arg24[%c1_149, %c0_150, %c0_151] : memref<2x1x32xf32, #tpu.memory_space<vmem>>, vector<1x1x32xf32>
      %260 = vector.shape_cast %259 : vector<1x1x32xf32> to vector<1x32xf32>
      %261 = vector.broadcast %260 : vector<1x32xf32> to vector<8x32xf32>
      %262 = arith.addf %258, %261 : vector<8x32xf32>
      %cst_152 = arith.constant dense<0.000000e+00> : vector<8xf32>
      %263 = vector.multi_reduction <add>, %244, %cst_152 [1] : vector<8x32xf32> to vector<8xf32>
      %264 = vector.shape_cast %263 : vector<8xf32> to vector<8x1xf32>
      %cst_153 = arith.constant 3.200000e+01 : f32
      %265 = vector.broadcast %cst_153 : f32 to vector<8x1xf32>
      %266 = arith.divf %264, %265 : vector<8x1xf32>
      %267 = vector.broadcast %266 : vector<8x1xf32> to vector<8x32xf32>
      %268 = arith.subf %244, %267 : vector<8x32xf32>
      %269 = arith.mulf %268, %268 : vector<8x32xf32>
      %cst_154 = arith.constant dense<0.000000e+00> : vector<8xf32>
      %270 = vector.multi_reduction <add>, %269, %cst_154 [1] : vector<8x32xf32> to vector<8xf32>
      %271 = vector.shape_cast %270 : vector<8xf32> to vector<8x1xf32>
      %cst_155 = arith.constant 3.200000e+01 : f32
      %272 = vector.broadcast %cst_155 : f32 to vector<8x1xf32>
      %273 = arith.divf %271, %272 : vector<8x1xf32>
      %cst_156 = arith.constant 9.99999997E-7 : f32
      %274 = vector.broadcast %cst_156 : f32 to vector<8x1xf32>
      %275 = arith.addf %273, %274 : vector<8x1xf32>
      %276 = math.rsqrt %275 : vector<8x1xf32>
      %277 = vector.broadcast %276 : vector<8x1xf32> to vector<8x32xf32>
      %278 = arith.mulf %268, %277 : vector<8x32xf32>
      %cst_157 = arith.constant 1.000000e+00 : f32
      %279 = vector.broadcast %cst_157 : f32 to vector<8x32xf32>
      %280 = arith.addf %279, %262 : vector<8x32xf32>
      %281 = arith.mulf %278, %280 : vector<8x32xf32>
      %282 = arith.addf %281, %255 : vector<8x32xf32>
      %283 = arith.truncf %282 : vector<8x32xf32> to vector<8x32xbf16>
      %c0_158 = arith.constant 0 : index
      %c0_159 = arith.constant 0 : index
      %284 = vector.load %arg25[%c0_158, %c0_159] : memref<32x128xbf16, #tpu.memory_space<vmem>>, vector<32x128xbf16>
      %cst_160 = arith.constant dense<0.000000e+00> : vector<8x128xf32>
      %285 = tpu.matmul %283, %284, %cst_160 {dimension_numbers = #tpu.dot_dimension_numbers<[1], [0], [0], [1], [0, 0, 1, 1], [], []>} : vector<8x32xbf16>, vector<32x128xbf16>, vector<8x128xf32> -> vector<8x128xf32>
      %c0_161 = arith.constant 0 : index
      %c0_162 = arith.constant 0 : index
      %286 = vector.load %arg26[%c0_161, %c0_162] : memref<1x128xf32, #tpu.memory_space<vmem>>, vector<1x128xf32>
      %287 = vector.broadcast %286 : vector<1x128xf32> to vector<8x128xf32>
      %288 = arith.addf %285, %287 : vector<8x128xf32>
      %c0_163 = arith.constant 0 : index
      %c0_164 = arith.constant 0 : index
      %c0_165 = arith.constant 0 : index
      %289 = vector.load %arg27[%c0_163, %c0_164, %c0_165] : memref<1x8x128xf32, #tpu.memory_space<vmem>>, vector<1x8x128xf32>
      %290 = vector.shape_cast %289 : vector<1x8x128xf32> to vector<8x128xf32>
      %291 = vector.shape_cast %288 : vector<8x128xf32> to vector<1x8x128xf32>
      tpu.vector_store %arg27[%c0_163, %c0_164, %c0_165], %291 {strides = array<i32>} : memref<1x8x128xf32, #tpu.memory_space<vmem>>, vector<1x8x128xf32>,
    } else {
    }
    return
  }
  func.func @transform_0(%arg0: i32, %arg1: i32) -> (i32, i32, i32) {
    %c0_i32 = arith.constant 0 : i32
    %c0_i32_0 = arith.constant 0 : i32
    %c0_i32_1 = arith.constant 0 : i32
    return %arg0, %c0_i32, %c0_i32_0 : i32, i32, i32
  }
  func.func @transform_1(%arg0: i32, %arg1: i32) -> (i32, i32, i32) {
    %c0_i32 = arith.constant 0 : i32
    %c0_i32_0 = arith.constant 0 : i32
    %c0_i32_1 = arith.constant 0 : i32
    return %arg0, %c0_i32, %c0_i32_0 : i32, i32, i32
  }
  func.func @transform_2(%arg0: i32, %arg1: i32) -> (i32, i32, i32) {
    %c0_i32 = arith.constant 0 : i32
    %c0_i32_0 = arith.constant 0 : i32
    %c0_i32_1 = arith.constant 0 : i32
    return %arg0, %c0_i32, %c0_i32_0 : i32, i32, i32
  }
  func.func @transform_3(%arg0: i32, %arg1: i32) -> (i32, i32) {
    %c0_i32 = arith.constant 0 : i32
    %c0_i32_0 = arith.constant 0 : i32
    %c0_i32_1 = arith.constant 0 : i32
    return %c0_i32, %c0_i32_0 : i32, i32
  }
  func.func @transform_4(%arg0: i32, %arg1: i32) -> (i32, i32) {
    %c0_i32 = arith.constant 0 : i32
    %c0_i32_0 = arith.constant 0 : i32
    %c0_i32_1 = arith.constant 0 : i32
    return %c0_i32, %c0_i32_0 : i32, i32
  }
  func.func @transform_5(%arg0: i32, %arg1: i32) -> (i32, i32) {
    %c0_i32 = arith.constant 0 : i32
    %c0_i32_0 = arith.constant 0 : i32
    %c0_i32_1 = arith.constant 0 : i32
    return %c0_i32, %c0_i32_0 : i32, i32
  }
  func.func @transform_6(%arg0: i32, %arg1: i32) -> (i32, i32) {
    %c0_i32 = arith.constant 0 : i32
    %c0_i32_0 = arith.constant 0 : i32
    %c0_i32_1 = arith.constant 0 : i32
    return %c0_i32, %c0_i32_0 : i32, i32
  }
  func.func @transform_7(%arg0: i32, %arg1: i32) -> (i32, i32, i32, i32) {
    %c0_i32 = arith.constant 0 : i32
    %c0_i32_0 = arith.constant 0 : i32
    %c0_i32_1 = arith.constant 0 : i32
    %c0_i32_2 = arith.constant 0 : i32
    return %arg1, %c0_i32, %c0_i32_0, %c0_i32_1 : i32, i32, i32, i32
  }
  func.func @transform_8(%arg0: i32, %arg1: i32) -> (i32, i32, i32, i32) {
    %c0_i32 = arith.constant 0 : i32
    %c0_i32_0 = arith.constant 0 : i32
    %c0_i32_1 = arith.constant 0 : i32
    %c0_i32_2 = arith.constant 0 : i32
    return %arg1, %c0_i32, %c0_i32_0, %c0_i32_1 : i32, i32, i32, i32
  }
  func.func @transform_9(%arg0: i32, %arg1: i32) -> (i32, i32, i32) {
    %c0_i32 = arith.constant 0 : i32
    %c0_i32_0 = arith.constant 0 : i32
    %c0_i32_1 = arith.constant 0 : i32
    return %arg1, %c0_i32, %c0_i32_0 : i32, i32, i32
  }
  func.func @transform_10(%arg0: i32, %arg1: i32) -> (i32, i32, i32) {
    %c0_i32 = arith.constant 0 : i32
    %c0_i32_0 = arith.constant 0 : i32
    %c0_i32_1 = arith.constant 0 : i32
    return %arg1, %c0_i32, %c0_i32_0 : i32, i32, i32
  }
  func.func @transform_11(%arg0: i32, %arg1: i32) -> (i32, i32, i32) {
    %c0_i32 = arith.constant 0 : i32
    %c0_i32_0 = arith.constant 0 : i32
    %c0_i32_1 = arith.constant 0 : i32
    return %arg1, %c0_i32, %c0_i32_0 : i32, i32, i32
  }
  func.func @transform_12(%arg0: i32, %arg1: i32) -> (i32, i32, i32) {
    %c0_i32 = arith.constant 0 : i32
    %c0_i32_0 = arith.constant 0 : i32
    %c0_i32_1 = arith.constant 0 : i32
    return %arg1, %c0_i32, %c0_i32_0 : i32, i32, i32
  }
  func.func @transform_13(%arg0: i32, %arg1: i32) -> (i32, i32, i32) {
    %c0_i32 = arith.constant 0 : i32
    %c0_i32_0 = arith.constant 0 : i32
    %c0_i32_1 = arith.constant 0 : i32
    return %arg1, %c0_i32, %c0_i32_0 : i32, i32, i32
  }
  func.func @transform_14(%arg0: i32, %arg1: i32) -> (i32, i32, i32) {
    %c0_i32 = arith.constant 0 : i32
    %c0_i32_0 = arith.constant 0 : i32
    %c0_i32_1 = arith.constant 0 : i32
    return %arg1, %c0_i32, %c0_i32_0 : i32, i32, i32
  }
  func.func @transform_15(%arg0: i32, %arg1: i32) -> (i32, i32, i32) {
    %c0_i32 = arith.constant 0 : i32
    %c0_i32_0 = arith.constant 0 : i32
    %c0_i32_1 = arith.constant 0 : i32
    return %arg1, %c0_i32, %c0_i32_0 : i32, i32, i32
  }
  func.func @transform_16(%arg0: i32, %arg1: i32) -> (i32, i32, i32) {
    %c0_i32 = arith.constant 0 : i32
    %c0_i32_0 = arith.constant 0 : i32
    %c0_i32_1 = arith.constant 0 : i32
    return %arg1, %c0_i32, %c0_i32_0 : i32, i32, i32
  }
  func.func @transform_17(%arg0: i32, %arg1: i32) -> (i32, i32, i32) {
    %c0_i32 = arith.constant 0 : i32
    %c0_i32_0 = arith.constant 0 : i32
    %c0_i32_1 = arith.constant 0 : i32
    return %arg1, %c0_i32, %c0_i32_0 : i32, i32, i32
  }
  func.func @transform_18(%arg0: i32, %arg1: i32) -> (i32, i32, i32) {
    %c0_i32 = arith.constant 0 : i32
    %c0_i32_0 = arith.constant 0 : i32
    %c0_i32_1 = arith.constant 0 : i32
    return %arg1, %c0_i32, %c0_i32_0 : i32, i32, i32
  }
  func.func @transform_19(%arg0: i32, %arg1: i32) -> (i32, i32, i32) {
    %c0_i32 = arith.constant 0 : i32
    %c0_i32_0 = arith.constant 0 : i32
    %c0_i32_1 = arith.constant 0 : i32
    return %arg1, %c0_i32, %c0_i32_0 : i32, i32, i32
  }
  func.func @transform_20(%arg0: i32, %arg1: i32) -> (i32, i32, i32) {
    %c0_i32 = arith.constant 0 : i32
    %c0_i32_0 = arith.constant 0 : i32
    %c0_i32_1 = arith.constant 0 : i32
    return %arg1, %c0_i32, %c0_i32_0 : i32, i32, i32
  }
  func.func @transform_21(%arg0: i32, %arg1: i32) -> (i32, i32, i32) {
    %c0_i32 = arith.constant 0 : i32
    %c0_i32_0 = arith.constant 0 : i32
    %c0_i32_1 = arith.constant 0 : i32
    %c0_i32_2 = arith.constant 0 : i32
    return %c0_i32, %c0_i32_0, %c0_i32_1 : i32, i32, i32
  }
  func.func @transform_22(%arg0: i32, %arg1: i32) -> (i32, i32, i32) {
    %c0_i32 = arith.constant 0 : i32
    %c0_i32_0 = arith.constant 0 : i32
    %c0_i32_1 = arith.constant 0 : i32
    %c0_i32_2 = arith.constant 0 : i32
    return %c0_i32, %c0_i32_0, %c0_i32_1 : i32, i32, i32
  }
  func.func @transform_23(%arg0: i32, %arg1: i32) -> (i32, i32) {
    %c0_i32 = arith.constant 0 : i32
    %c0_i32_0 = arith.constant 0 : i32
    %c0_i32_1 = arith.constant 0 : i32
    return %c0_i32, %c0_i32_0 : i32, i32
  }
  func.func @transform_24(%arg0: i32, %arg1: i32) -> (i32, i32) {
    %c0_i32 = arith.constant 0 : i32
    %c0_i32_0 = arith.constant 0 : i32
    %c0_i32_1 = arith.constant 0 : i32
    return %c0_i32, %c0_i32_0 : i32, i32
  }
  func.func @transform_25(%arg0: i32, %arg1: i32) -> (i32, i32, i32) {
    %c0_i32 = arith.constant 0 : i32
    %c0_i32_0 = arith.constant 0 : i32
    %c0_i32_1 = arith.constant 0 : i32
    return %arg0, %c0_i32, %c0_i32_0 : i32, i32, i32
  }
}

</mosaic_0001>

<bundles_post_ra>
// kernel: gpt_adaln_forward.1
= control target key start
LH: loop header
LB: loop body
LE: loop exit
PB: predicated region body
PF: predicated region fallthrough
CT: control target
= control target key end

     0   :  { %s3964_s29 = smov 0   ;;  %s3970_s30 = smov 0   ;;  %s4470_s0 = inlined_call_operand.vmem [shape: f32[2,8,128], index: 0, kind: input, shape index: {}]   ;;  %s4471_s1 = inlined_call_operand.vmem [shape: f32[2,8,128], index: 1, kind: input, shape index: {}]   ;;  %s4472_s2 = inlined_call_operand.vmem [shape: f32[2,8,32], index: 2, kind: input, shape index: {}]   ;;  %s4473_s3 = inlined_call_operand.vmem [shape: bf16[128,32], index: 3, kind: input, shape index: {}]   ;;  %s4474_s4 = inlined_call_operand.vmem [shape: f32[1,32], index: 4, kind: input, shape index: {}]   ;;  %s4475_s5 = inlined_call_operand.vmem [shape: bf16[128,32], index: 5, kind: input, shape index: {}]   ;;  %s4476_s6 = inlined_call_operand.vmem [shape: f32[1,32], index: 6, kind: input, shape index: {}]   ;;  %s4477_s7 = inlined_call_operand.vmem [shape: bf16[2,6,32,32], index: 7, kind: input, shape index: {}]   ;;  %s4478_s8 = inlined_call_operand.vmem [shape: f32[2,6,1,32], index: 8, kind: input, shape index: {}]   ;;  %s4479_s9 = inlined_call_operand.vmem [shape: bf16[2,32,32], index: 9, kind: input, shape index: {}]   ;;  %s4480_s10 = inlined_call_operand.vmem [shape: f32[2,1,32], index: 10, kind: input, shape index: {}]   ;;  %s4481_s11 = inlined_call_operand.vmem [shape: bf16[2,32,32], index: 11, kind: input, shape index: {}]   ;;  %s4482_s12 = inlined_call_operand.vmem [shape: f32[2,1,32], index: 12, kind: input, shape index: {}]   ;;  %s4483_s13 = inlined_call_operand.vmem [shape: bf16[2,32,32], index: 13, kind: input, shape index: {}]   ;;  %s4484_s14 = inlined_call_operand.vmem [shape: f32[2,1,32], index: 14, kind: input, shape index: {}]   ;;  %s4485_s15 = inlined_call_operand.vmem [shape: bf16[2,32,32], index: 15, kind: input, shape index: {}]   ;;  %s4486_s16 = inlined_call_operand.vmem [shape: f32[2,1,32], index: 16, kind: input, shape index: {}]   ;;  %s4487_s17 = inlined_call_operand.vmem [shape: bf16[2,32,64], index: 17, kind: input, shape index: {}]   ;;  %s4488_s18 = inlined_call_operand.vmem [shape: f32[2,1,64], index: 18, kind: input, shape index: {}]   ;;  %s4489_s19 = inlined_call_operand.vmem [shape: bf16[2,64,32], index: 19, kind: input, shape index: {}]   ;;  %s4490_s20 = inlined_call_operand.vmem [shape: f32[2,1,32], index: 20, kind: input, shape index: {}]   ;;  %s4491_s21 = inlined_call_operand.vmem [shape: bf16[2,32,32], index: 21, kind: input, shape index: {}]   ;;  %s4492_s22 = inlined_call_operand.vmem [shape: f32[2,1,32], index: 22, kind: input, shape index: {}]   ;;  %s4493_s23 = inlined_call_operand.vmem [shape: bf16[32,128], index: 23, kind: input, shape index: {}]   ;;  %s4494_s24 = inlined_call_operand.vmem [shape: f32[1,128], index: 24, kind: input, shape index: {}]   ;;  %s4495_s25 = inlined_call_operand.vmem [shape: f32[2,8,128], index: 25, kind: output, shape index: {}]  }
   0x1   :  { %4506 = sst [smem:[#allocation11_spill]] %s4470_s0 }
   0x2   :  { %4507 = sst [smem:[#allocation12_spill]] %s4471_s1 }
   0x3   :  { %4508 = sst [smem:[#allocation13_spill]] %s4472_s2  ;;  %s3966_s2 = smov 0  }
   0x4   :  { %4509 = sst [smem:[#allocation14_spill]] %s4473_s3 }
   0x5   :  { %4510 = sst [smem:[#allocation15_spill]] %s4474_s4 }
   0x6   :  { %4511 = sst [smem:[#allocation16_spill]] %s4475_s5 }
   0x7   :  { %4512 = sst [smem:[#allocation17_spill]] %s4476_s6  ;;  %s3968_s6 = smov 0  }
   0x8   :  { %4513 = sst [smem:[#allocation18_spill]] %s4477_s7  ;;  %s3972_s7 = smov 0  }
   0x9   :  { %4514 = sst [smem:[#allocation19_spill]] %s4478_s8 }
   0xa   :  { %4515 = sst [smem:[#allocation20_spill]] %s4479_s9 }
   0xb   :  { %4516 = sst [smem:[#allocation21_spill]] %s4481_s11 }
   0xc   :  { %4517 = sst [smem:[#allocation22_spill]] %s4483_s13 }
   0xd   :  { %4518 = sst [smem:[#allocation23_spill]] %s4484_s14 }
   0xe   :  { %4519 = sst [smem:[#allocation24_spill]] %s4485_s15 }
   0xf   :  { %4520 = sst [smem:[#allocation25_spill]] %s4489_s19 }
  0x10   :  { %4521 = sst [smem:[#allocation26_spill]] %s4490_s20 }
  0x11   :  { %4522 = sst [smem:[#allocation27_spill]] %s4491_s21 }
  0x12   :  { %4523 = sst [smem:[#allocation28_spill]] %s4492_s22 }
  0x13   :  { %4524 = sst [smem:[#allocation29_spill]] %s4493_s23 }
  0x14   :  { %4525 = sst [smem:[#allocation30_spill]] %s4494_s24 }
  0x15   :  { %4526 = sst [smem:[#allocation31_spill]] %s4495_s25 }
  0x16 LB: > { %4527 = sst [smem:[#allocation4_spill]] %s3806_s29  ;;  %s44_s3 = sadd.s32 1, %s3814_s6  ;;  %s3822_s7 = sphi %s3972_s7, %s35_s7   ;;  %s3818_s30 = sphi %s3970_s30, %s4576_s30   ;;  %s3814_s6 = sphi %s3968_s6, %s4575_s6   ;;  %s3810_s2 = sphi %s3966_s2, %s4574_s2   ;;  %s3806_s29 = sphi %s3964_s29, %s4573_s29  }
  0x17   : > { %4528 = sst [smem:[#allocation5_spill]] %s3814_s6  ;;  %s47_s26 = sadd.s32 1, %s3818_s30 }
  0x18   : > { %4529 = sst [smem:[#allocation6_spill]] %s3818_s30  ;;  %p45_p0 = scmp.ge.s32.totalorder %s44_s3, 2 }
  0x19   : > { %4530 = sst [smem:[#allocation7_spill]] %s3822_s7  ;;  %p3194_p1 = scmp.ge.s32.totalorder %s3822_s7, 1 }
  0x1a   : > { %p843_p2 = scmp.lt.s32.totalorder %s3822_s7, 5  ;;  %s4578_s3 = smov (%p45_p0, %s44_s3), 0 }
  0x1b   : > { %4531 = sst [smem:[#allocation8_spill]] %s4578_s3  ;;  %s4580_s26 = smov (!%p45_p0, %s47_s26), %s3818_s30 }
  0x1c   : > { %p844_p3 = pnand %p3194_p1, %p843_p2  ;;  %p49_p4 = scmp.ge.s32.totalorder %s4580_s26, 2 }
  0x1e   : > { %s4582_s26 = smov (%p49_p4, %s4580_s26), 0  ;;  %847 = sbr.rel (%p844_p3) target bundleno = 4554 (0x11ca), region = 120 }
  0x1f   : > { %4532 = sst [smem:[#allocation9_spill]] %s4582_s26 }
  0x25   : > { %p974_p5 = scmp.lt.s32.totalorder %s3810_s2, 1  ;;  %p986_p6 = scmp.lt.s32.totalorder %s3806_s29, 1  ;;  %v1048_v0 = vlaneseq  ;;  %v3824_v3 = vmov -1e+30  }
  0x26   : > { %s4536_s9 = sld [smem:[#allocation18_spill]]  ;;  %s4537_s3 = sld [smem:[#allocation20_spill]] }
  0x27   : > { %s4584_s2 = smov (!%p974_p5, %s3810_s2), 1  ;;  %v1049_v1 = vshrl.u32 %v1048_v0, 7  ;;  %v1051_v2 = vand.u32 127, %v1048_v0  ;;  %s4539_s11 = sld [smem:[#allocation21_spill]] }
  0x28   : > { %s3998_s1 = scalar_select %p986_p6, %s3806_s29, 1 }
  0x29   : > { %s4000_s8 = sshll.u32 %s4584_s2, 3  ;;  %vm1052_vm0 = vcmp.ge.s32.totalorder %v1049_v1, %v1051_v2  ;;  %s4538_s2 = sld [smem:[#allocation19_spill]] }
  0x2a   : > { %v4010_v4 = vsel %vm1052_vm0, 0.0, %v3824_v3  ;;  %s3656_s24 = smul.u32 96, %s3998_s1  ;;  %s3336_s27 = sshll.u32 %s3998_s1, 4 }
  0x2b   : > { %s3657_s22 = smul.u32 6, %s3998_s1  ;;  %s4540_s13 = sld [smem:[#allocation22_spill]] }
  0x2c   : > { %s4022_s5 = scalar_lea.vmem %s4536_s9, %s3656_s24  ;;  %s4027_s23 = scalar_lea.vmem %s4537_s3, %s3336_s27 }
  0x2d   : > { %s4041_s4 = scalar_lea.vmem %s4539_s11, %s3336_s27  ;;  %s4542_s15 = sld [smem:[#allocation24_spill]] }
  0x2e   : > { %s4068_s28 = scalar_lea.vmem %s4487_s17, %s3336_s27  ;;  %s1034_s11 = scalar_lea.vmem %s4488_s18, %s3998_s1 }
  0x2f   : > { %s4032_s6 = scalar_lea.vmem %s4538_s2, %s3657_s22  ;;  %s3341_s21 = sshll.u32 %s3998_s1, 5 }
  0x30   : > { %s4546_s25 = sld [smem:[#allocation31_spill]] }
  0x31   : > { %s4050_s0 = scalar_lea.vmem %s4540_s13, %s3336_s27  ;;  %s4544_s13 = sld [smem:[#allocation26_spill]] }
  0x33   : > { %s4059_s2 = scalar_lea.vmem %s4542_s15, %s3336_s27  ;;  %s4547_s27 = sld [smem:[#allocation4_spill]] }
  0x34   : > { %4543 = sst [smem:[#allocation10_spill]] %s4059_s2 }
  0x35   : > { %s4545_s2 = sld [smem:[#allocation25_spill]] }
  0x36   : > { %s1046_s24 = scalar_lea.vmem %s4546_s25, %s4000_s8 }
  0x37   : > { %s1042_s29 = scalar_lea.vmem %s4544_s13, %s3998_s1 }
  0x39   : > { %p3212_p7 = scmp.ne.s32.totalorder %s4547_s27, 0 }
  0x3a   : > { %s4548_s26 = sld [smem:[#allocation14_spill]] (!%p3212_p7)  ;;  %v3825_v6 = vmov (!%p3212_p7), 0.0   ;;  %s4549_s22 = sld [smem:[#allocation16_spill]] (!%p3212_p7)  ;;  %vm3826_vm1 = vmmov (!%p3212_p7), 0   ;;  %vm1301_vm2 = vcmask (!%p3212_p7), 261120   ;;  %vm1181_vm3 = vcmask (!%p3212_p7), 257024  }
  0x3b   : > { %s4082_s14 = scalar_lea.vmem %s4545_s2, %s3341_s21  ;;  %1057 = sbr.rel (%p3212_p7) target bundleno = 343 (0x157), region = 124  ;;  %3428 = vmatprep.subr.bf16.mxu0 (!%p3212_p7), %v3825_v6  ;;  %3448 = vmatprep.subr.bf16.mxu1 (!%p3212_p7), %v3825_v6 }
  0x3c   : > { %3444 = vmatprep.mubr.msk.bf16.mxu0 (!%p3212_p7), %vm3826_vm1, %v3825_v6  ;;  %3464 = vmatprep.mubr.msk.bf16.mxu1 (!%p3212_p7), %vm3826_vm1, %v3825_v6  ;;  %s4550_s7 = sld [smem:[#allocation11_spill]] (!%p3212_p7)  ;;  %s4552_s13 = sld [smem:[#allocation12_spill]] (!%p3212_p7) }
  0x3d   : > { %s4554_s25 = sld [smem:[#allocation15_spill]] (!%p3212_p7)  ;;  %s4556_s9 = sld [smem:[#allocation13_spill]] (!%p3212_p7) }
  0x40   : > { %v3708_v5 = vld [vmem:[%s4548_s26] sm:$0xff] (!%p3212_p7)   ;;  %v3710_v8 = vld [vmem:[%s4548_s26 + $0x8] sm:$0xff] (!%p3212_p7)   ;;  %v3712_v10 = vld [vmem:[%s4548_s26 + $0x10] sm:$0xff] (!%p3212_p7)  }
  0x41   : > { %v3709_v7 = vld [vmem:[%s4549_s22] sm:$0xff] (!%p3212_p7)   ;;  %3429 = vmatpush3.bf16.msra.mxu0 (!%p3212_p7), %v3708_v5  ;;  %v3711_v9 = vld [vmem:[%s4549_s22 + $0x8] sm:$0xff] (!%p3212_p7)   ;;  %v3713_v11 = vld [vmem:[%s4549_s22 + $0x10] sm:$0xff] (!%p3212_p7)  }
  0x42   : > { %3449 = vmatpush3.bf16.msra.mxu1 %v3709_v7  ;;  %3430 = vmatprep.subr.bf16.mxu0 %v3825_v6  ;;  %v3714_v12 = vld [vmem:[%s4548_s26 + $0x18] sm:$0xff]   ;;  %v3716_v14 = vld [vmem:[%s4548_s26 + $0x20] sm:$0xff]   ;;  %v3718_v16 = vld [vmem:[%s4548_s26 + $0x28] sm:$0xff]   ;;  %s4551_s19 = scalar_lea.vmem %s4550_s7, %s4000_s8  ;;  %s4553_s30 = scalar_lea.vmem %s4552_s13, %s4000_s8 }
  0x43   : > { %3450 = vmatprep.subr.bf16.mxu1 %v3825_v6  ;;  %v3715_v13 = vld [vmem:[%s4549_s22 + $0x18] sm:$0xff]   ;;  %v3717_v15 = vld [vmem:[%s4549_s22 + $0x20] sm:$0xff]   ;;  %v3719_v17 = vld [vmem:[%s4549_s22 + $0x28] sm:$0xff]   ;;  %s4557_s3 = scalar_lea.vmem %s4556_s9, %s4000_s8 }
  0x44   : > { %v3720_v18 = vld [vmem:[%s4548_s26 + $0x30] sm:$0xff]   ;;  %v3722_v20 = vld [vmem:[%s4548_s26 + $0x38] sm:$0xff]   ;;  %v1059_v21 = vld [vmem:[%s4551_s19] sm:$0xff]  ;;  %s4555_s19 = sld [smem:[#allocation17_spill]] }
  0x45   : > { %3431 = vmatpush3.bf16.msra.mxu0 %v3710_v8  ;;  %v3721_v19 = vld [vmem:[%s4549_s22 + $0x30] sm:$0xff]   ;;  %v3723_v22 = vld [vmem:[%s4549_s22 + $0x38] sm:$0xff]   ;;  %v1183_v23 = vld [vmem:[%s4553_s30] sm:$0xff]  ;;  %v1077_v24 = vpack.c.bf16 %v1059_v21, %v1059_v21 }
  0x46   : > { %3451 = vmatpush3.bf16.msra.mxu1 %v3711_v9  ;;  %3432 = vmatprep.subr.bf16.mxu0 %v3825_v6  ;;  %v1201_v25 = vpack.c.bf16 %v1183_v23, %v1183_v23  ;;  %v3213_v26 = vld [vmem:[%s4554_s25] ss:$0 sm:$0xff] }
  0x47   : > { %3452 = vmatprep.subr.bf16.mxu1 %v3825_v6  ;;  %v1058_v28 = vld [vmem:[%s4557_s3] sm:$0xff] }
  0x49   : > { %3433 = vmatpush3.bf16.msra.mxu0 %v3712_v10 }
  0x4a   : > { %3453 = vmatpush3.bf16.msra.mxu1 %v3713_v11  ;;  %3434 = vmatprep.subr.bf16.mxu0 %v3825_v6  ;;  %v3223_v27 = vld [vmem:[%s4555_s19] ss:$0 sm:$0xff] }
  0x4b   : > { %3454 = vmatprep.subr.bf16.mxu1 %v3825_v6 }
  0x4d   : > { %3435 = vmatpush3.bf16.msra.mxu0 %v3714_v12 }
  0x4e   : > { %3455 = vmatpush3.bf16.msra.mxu1 %v3715_v13  ;;  %3436 = vmatprep.subr.bf16.mxu0 %v3825_v6 }
  0x4f   : > { %3456 = vmatprep.subr.bf16.mxu1 %v3825_v6 }
  0x51   : > { %3437 = vmatpush3.bf16.msra.mxu0 %v3716_v14 }
  0x52   : > { %3457 = vmatpush3.bf16.msra.mxu1 %v3717_v15  ;;  %3438 = vmatprep.subr.bf16.mxu0 %v3825_v6 }
  0x53   : > { %3458 = vmatprep.subr.bf16.mxu1 %v3825_v6 }
  0x55   : > { %3439 = vmatpush3.bf16.msra.mxu0 %v3718_v16 }
  0x56   : > { %3459 = vmatpush3.bf16.msra.mxu1 %v3719_v17  ;;  %3440 = vmatprep.subr.bf16.mxu0 %v3825_v6 }
  0x57   : > { %3460 = vmatprep.subr.bf16.mxu1 %v3825_v6 }
  0x59   : > { %3441 = vmatpush3.bf16.msra.mxu0 %v3720_v18 }
  0x5a   : > { %3461 = vmatpush3.bf16.msra.mxu1 %v3721_v19  ;;  %3442 = vmatprep.subr.bf16.mxu0 %v3825_v6 }
  0x5b   : > { %3462 = vmatprep.subr.bf16.mxu1 %v3825_v6 }
  0x5d   : > { %3443 = vmatpush3.bf16.msra.mxu0 %v3722_v20 }
  0x5e   : > { %3463 = vmatpush3.bf16.msra.mxu1 %v3723_v22 }
  0x60   : > { %3445 = vmatmul.mubr.bf16.vlgmr.msra.gmra.mrb[0].mxu0 %v1077_v24 }
  0x61   : > { %3465 = vmatmul.mubr.bf16.vlgmr.msra.gmra.mrb[0].mxu1 %v1201_v25 }
 0x133   : > { %v1166_v29 = vpop.f32.mrb[0].mxu0 }
 0x134   : > { %v1167_v30 = vadd.f32 %v3213_v26, %v1166_v29  ;;  %v3446_v31 = vpop.f32.mrb[1].mxu0  ;;  %v1290_v32 = vpop.f32.mrb[0].mxu1 }
 0x135   : > { %v1169_v33 = vpop.f32.mrb[2].mxu0  ;;  %v1291_v34 = vadd.f32 %v3223_v27, %v1290_v32  ;;  %v3466_v35 = vpop.f32.mrb[1].mxu1 }
 0x136   : > { %v1172_v36 = vadd.f32 %v1167_v30, %v1058_v28  ;;  %v3447_v37 = vpop.f32.mrb[3].mxu0  ;;  %v1293_v38 = vpop.f32.mrb[2].mxu1 }
 0x137   : > { %v1297_v39 = vmul.f32 0.70710677, %v1291_v34  ;;  %v3467_v40 = vpop.f32.mrb[3].mxu1  ;;  %v1296_v42 = vmul.f32 0.5, %v1291_v34 }
 0x138   : > { %v3222_v41 = vmul.f32 -1.442695, %v1172_v36 }
 0x139   : > { %3724 = verf.f32 %v1297_v39 }
 0x13a   : > { %3726 = vpow2.f32 %v3222_v41 }
 0x143   : > { %v3725_v43 = vpop.eup %3724 }
 0x144   : > { %v3727_v44 = vpop.eup %3726  ;;  %v1299_v45 = vadd.f32 1.0, %v3725_v43 }
 0x145   : > { %v1176_v46 = vadd.f32 1.0, %v3727_v44 }
 0x146   : > { %v1300_v47 = vmul.f32 %v1299_v45, %v1296_v42 }
 0x147   : > { %3728 = vrcp.f32 %v1176_v46 }
 0x148   : > { %1302 = vst.msk [vmem:[#allocation2] sm:$0xff] %vm1301_vm2, %v1300_v47 }
 0x151   : > { %v3729_v48 = vpop.eup %3728 }
 0x152   : > { %v1179_v49 = vmul.f32 %v3729_v48, %v1172_v36 }
 0x154   : > { %v1180_v50 = vpack.c.bf16 %v1179_v49, %v1179_v49 }
 0x156   : > { %1182 = vst.msk [vmem:[#allocation3] sm:$0xf] %vm1181_vm3, %v1180_v50 }
 0x157 PF: > { %v4158_v51 = vld [vmem:[#allocation2] sm:$0xff]  ;;  %vm1328_vm4 = vcmask 261120   ;;  %v3827_v54 = vmov 0.0   ;;  %v3731_v55 = vld [vmem:[%s4022_s5 + $0x8] sm:$0xff]   ;;  %vm3828_vm5 = vmmov 0   ;;  %v3732_v57 = vld [vmem:[%s4022_s5 + $0x10] sm:$0xff]   ;;  %s4559_s30 = scalar_lea.vmem %s4480_s10, %s3998_s1 }
 0x158   : > { %v3730_v52 = vld [vmem:[%s4022_s5] sm:$0xff]   ;;  %v1697_v53 = vsel %vm1328_vm4, %v4158_v51, 0.0  ;;  %3468 = vmatprep.subr.bf16.mxu1 %v3827_v54  ;;  %3484 = vmatprep.subr.bf16.mxu0 %v3827_v54  ;;  %v3733_v58 = vld [vmem:[%s4022_s5 + $0x18] sm:$0xff]   ;;  %v3734_v59 = vld [vmem:[%s4022_s5 + $0x30] sm:$0xff]   ;;  %vm1914_vm6 = vcmask 64512   ;;  %s3829_s15 = smov 120  }
 0x159   : > { %1698 = vadd.xlane.f32.xlu0 %v1697_v53  ;;  %3469 = vmatpush3.bf16.msra.mxu1 %v3730_v52  ;;  %v3735_v1 = vld [vmem:[%s4022_s5 + $0x20] sm:$0xff]   ;;  %v3736_v2 = vld [vmem:[%s4022_s5 + $0x38] sm:$0xff]   ;;  %v3737_v3 = vld [vmem:[%s4022_s5 + $0x28] sm:$0xff]   ;;  %s4560_s21 = sld [smem:[#allocation23_spill]]  ;;  %vm1978_vm7 = vcmask 1043456   ;;  %s3830_s19 = smov 112  }
 0x15a   : > { %3470 = vmatprep.subr.bf16.mxu1 %v3827_v54  ;;  %3472 = vmatprep.mubr.msk.bf16.mxu1 %vm3828_vm5, %v3827_v54  ;;  %v3738_v5 = vld [vmem:[%s4022_s5 + $0x50] sm:$0xff]   ;;  %v3739_v6 = vld [vmem:[%s4022_s5 + $0x40] sm:$0xff]   ;;  %v3740_v7 = vld [vmem:[%s4022_s5 + $0x58] sm:$0xff]   ;;  %s4562_s20 = sld [smem:[#allocation10_spill]]  ;;  %s3831_s27 = smov 104   ;;  %vm2689_vm8 = vcmask 523264  }
 0x15b   : > { %3488 = vmatprep.mubr.msk.bf16.mxu0 %vm3828_vm5, %v3827_v54  ;;  %3485 = vmatpush3.bf16.msra.mxu0 %v3735_v1  ;;  %v3741_v8 = vld [vmem:[%s4022_s5 + $0x48] sm:$0xff]   ;;  %v3742_v9 = vld [vmem:[%s4027_s23] sm:$0xff]  }
 0x15c   : > { %3486 = vmatprep.subr.bf16.mxu0 %v3827_v54  ;;  %v3743_v10 = vld [vmem:[%s4041_s4] sm:$0xff]   ;;  %v3744_v11 = vld [vmem:[%s4027_s23 + $0x8] sm:$0xff]   ;;  %s4563_s23 = scalar_lea.vmem %s4486_s16, %s3998_s1 }
 0x15d   : > { %v4169_v56 = vld [vmem:[#allocation3] sm:$0xf]  ;;  %3471 = vmatpush3.bf16.msra.mxu1 %v3731_v55  ;;  %v3241_v24 = vld [vmem:[%s4032_s6 + $0x1] ss:$0 sm:$0xff]  ;;  %v3232_v28 = vld [vmem:[%s4032_s6] ss:$0 sm:$0xff] }
 0x15e   : > { %3476 = vmatprep.subr.bf16.mxu1 %v3827_v54  ;;  %v3745_v12 = vld [vmem:[%s4041_s4 + $0x8] sm:$0xff]   ;;  %v3746_v33 = vld [vmem:[%s4050_s0] sm:$0xff]   ;;  %s4558_s4 = scalar_lea.vmem %s4482_s12, %s3998_s1 }
 0x15f   : > { %3487 = vmatpush3.bf16.msra.mxu0 %v3737_v3  ;;  %v3747_v35 = vld [vmem:[%s4050_s0 + $0x8] sm:$0xff]   ;;  %v3285_v53 = vld [vmem:[%s4558_s4] ss:$0 sm:$0xff]  ;;  %s4561_s7 = scalar_lea.vmem %s4560_s21, %s3998_s1 }
 0x160   : > { %3473 = vmatmul.mubr.msk.bf16.vlgmr.msra.gmra.mrb[0].mxu1 %vm1328_vm4, %v4169_v56  ;;  %3500 = vmatprep.subr.bf16.mxu0 %v3827_v54  ;;  %v3281_v55 = vld [vmem:[%s4559_s30] ss:$0 sm:$0xff] }
 0x161   : > { %3477 = vmatpush3.bf16.msra.mxu1 %v3732_v57  ;;  %3480 = vmatprep.mubr.msk.bf16.mxu1 %vm3828_vm5, %v3827_v54 }
 0x162   : > { %3478 = vmatprep.subr.bf16.mxu1 %v3827_v54  ;;  %3489 = vmatmul.mubr.msk.bf16.vlgmr.msra.gmra.mrb[0].mxu0 %vm1328_vm4, %v4169_v56 }
 0x163   : > { %3501 = vmatpush3.bf16.msra.mxu0 %v3739_v6  ;;  %3504 = vmatprep.mubr.msk.bf16.mxu0 %vm3828_vm5, %v3827_v54  ;;  %v3289_v6 = vld [vmem:[%s4561_s7] ss:$0 sm:$0xff] }
 0x164   : > { %3502 = vmatprep.subr.bf16.mxu0 %v3827_v54 }
 0x165   : > { %3479 = vmatpush3.bf16.msra.mxu1 %v3733_v58 }
 0x166   : > { %3492 = vmatprep.subr.bf16.mxu1 %v3827_v54 }
 0x167   : > { %3503 = vmatpush3.bf16.msra.mxu0 %v3741_v8 }
 0x168   : > { %3481 = vmatmul.mubr.msk.bf16.vlgmr.msra.gmra.mrb[4].mxu1 %vm1328_vm4, %v4169_v56  ;;  %3516 = vmatprep.subr.bf16.mxu0 %v3827_v54 }
 0x169   : > { %3496 = vmatprep.mubr.msk.bf16.mxu1 %vm3828_vm5, %v3827_v54  ;;  %3493 = vmatpush3.bf16.msra.mxu1 %v3734_v59 }
 0x16a   : > { %3494 = vmatprep.subr.bf16.mxu1 %v3827_v54  ;;  %3505 = vmatmul.mubr.msk.bf16.vlgmr.msra.gmra.mrb[4].mxu0 %vm1328_vm4, %v4169_v56 }
 0x16b   : > { %3517 = vmatpush3.bf16.msra.mxu0 %v3742_v9  ;;  %3520 = vmatprep.mubr.msk.bf16.mxu0 %vm3828_vm5, %v3827_v54 }
 0x16c   : > { %3518 = vmatprep.subr.bf16.mxu0 %v3827_v54 }
 0x16d   : > { %3495 = vmatpush3.bf16.msra.mxu1 %v3736_v2 }
 0x16e   : > { %3508 = vmatprep.subr.bf16.mxu1 %v3827_v54 }
 0x16f   : > { %3519 = vmatpush3.bf16.msra.mxu0 %v3744_v11 }
 0x170   : > { %3497 = vmatmul.mubr.msk.bf16.vlgmr.msra.gmra.mrb[8].mxu1 %vm1328_vm4, %v4169_v56  ;;  %3532 = vmatprep.subr.bf16.mxu0 %v3827_v54 }
 0x171   : > { %3509 = vmatpush3.bf16.msra.mxu1 %v3738_v5  ;;  %3512 = vmatprep.mubr.msk.bf16.mxu1 %vm3828_vm5, %v3827_v54 }
 0x172   : > { %3510 = vmatprep.subr.bf16.mxu1 %v3827_v54 }
 0x175   : > { %3511 = vmatpush3.bf16.msra.mxu1 %v3740_v7 }
 0x176   : > { %3524 = vmatprep.subr.bf16.mxu1 %v3827_v54 }
 0x178   : > { %3513 = vmatmul.mubr.msk.bf16.vlgmr.msra.gmra.mrb[12].mxu1 %vm1328_vm4, %v4169_v56 }
 0x179   : > { %3528 = vmatprep.mubr.msk.bf16.mxu1 %vm3828_vm5, %v3827_v54  ;;  %3525 = vmatpush3.bf16.msra.mxu1 %v3743_v10 }
 0x17a   : > { %3526 = vmatprep.subr.bf16.mxu1 %v3827_v54 }
 0x17d   : > { %3527 = vmatpush3.bf16.msra.mxu1 %v3745_v12 }
 0x17e   : > { %3540 = vmatprep.subr.bf16.mxu1 %v3827_v54 }
 0x1e6   : > { %v1699_v60 = vpop.xlane.xlu0 %1698 }
 0x1e7   : > { %v1701_v61 = vmul.f32 0.03125, %v1699_v60 }
 0x1e9   : > { %v1702_v62 = vsub.f32 %v4158_v51, %v1701_v61 }
 0x1eb   : > { %v1703_v63 = vmul.f32 %v1702_v62, %v1702_v62 }
 0x1ed   : > { %v1704_v0 = vsel %vm1328_vm4, %v1703_v63, 0.0 }
 0x1ee   : > { %1705 = vadd.xlane.f32.xlu0 %v1704_v0 }
 0x233   : > { %v1366_v13 = vpop.f32.mrb[0].mxu1 }
 0x234   : > { %v3474_v14 = vpop.f32.mrb[1].mxu1  ;;  %v1367_v30 = vadd.f32 %v3232_v28, %v1366_v13 }
 0x235   : > { %v1369_v15 = vpop.f32.mrb[2].mxu1  ;;  %v4245_v40 = vpop.f32.mrb[0].mxu0 }
 0x236   : > { %v3475_v16 = vpop.f32.mrb[3].mxu1  ;;  %v3490_v41 = vpop.f32.mrb[1].mxu0 }
 0x237   : > { %v1499_v42 = vpop.f32.mrb[2].mxu0 }
 0x238   : > { %v3491_v43 = vpop.f32.mrb[3].mxu0 }
 0x23b   : > { %v1431_v17 = vpop.f32.mrb[4].mxu1 }
 0x23c   : > { %v3482_v18 = vpop.f32.mrb[5].mxu1  ;;  %v1432_v25 = vadd.f32 %v3241_v24, %v1431_v17 }
 0x23d   : > { %v1434_v19 = vpop.f32.mrb[6].mxu1  ;;  %v4249_v48 = vpop.f32.mrb[4].mxu0 }
 0x23e   : > { %v3483_v20 = vpop.f32.mrb[7].mxu1  ;;  %v1711_v26 = vadd.f32 1.0, %v1432_v25  ;;  %v3506_v49 = vpop.f32.mrb[5].mxu0 }
 0x23f   : > { %v1629_v50 = vpop.f32.mrb[6].mxu0 }
 0x240   : > { %v3507_v52 = vpop.f32.mrb[7].mxu0  ;;  %v1911_v50 = vld [vmem:[%s4562_s20 + $0x4] sm:$0xf] }
 0x241   : > { %v2143_v52 = vsel %vm1978_vm7, %v1911_v50, 0 }
 0x243   : > { %v4243_v36 = vpop.f32.mrb[8].mxu1 }
 0x244   : > { %v3498_v37 = vpop.f32.mrb[9].mxu1 }
 0x245   : > { %v1564_v38 = vpop.f32.mrb[10].mxu1 }
 0x246   : > { %v3499_v39 = vpop.f32.mrb[11].mxu1 }
 0x24b   : > { %v4247_v44 = vpop.f32.mrb[12].mxu1 }
 0x24c   : > { %v3514_v45 = vpop.f32.mrb[13].mxu1 }
 0x24d   : > { %v1694_v46 = vpop.f32.mrb[14].mxu1 }
 0x24e   : > { %v3515_v47 = vpop.f32.mrb[15].mxu1 }
 0x27b   : > { %v1706_v21 = vpop.xlane.xlu0 %1705 }
 0x27c   : > { %v1707_v22 = vmul.f32 0.03125, %v1706_v21 }
 0x27e   : > { %v1708_v23 = vadd.f32 1e-06, %v1707_v22 }
 0x280   : > { %3754 = vrsqrt.f32 %v1708_v23 }
 0x28a   : > { %v3755_v27 = vpop.eup %3754 }
 0x28b   : > { %v1710_v29 = vmul.f32 %v3755_v27, %v1702_v62 }
 0x28d   : > { %v1712_v31 = vmul.f32 %v1711_v26, %v1710_v29 }
 0x28f   : > { %v1713_v32 = vadd.f32 %v1712_v31, %v1367_v30 }
 0x291   : > { %v1714_v34 = vpack.c.bf16 %v1713_v32, %v1713_v32 }
 0x293   : > { %3521 = vmatmul.mubr.msk.bf16.vlgmr.msra.gmra.mrb[8].mxu0 %vm1328_vm4, %v1714_v34  ;;  %3529 = vmatmul.mubr.msk.bf16.vlgmr.msra.gmra.mrb[16].mxu1 %vm1328_vm4, %v1714_v34 }
 0x294   : > { %3533 = vmatpush3.bf16.msra.mxu0 %v3746_v33  ;;  %3536 = vmatprep.mubr.msk.bf16.mxu0 %vm3828_vm5, %v3827_v54 }
 0x295   : > { %3534 = vmatprep.subr.bf16.mxu0 %v3827_v54  ;;  %3542 = vmatprep.mubr.msk.bf16.mxu1 %vm3828_vm5, %v3827_v54 }
 0x298   : > { %3535 = vmatpush3.bf16.msra.mxu0 %v3747_v35 }
 0x299   : > { %3546 = vmatprep.subr.bf16.mxu0 %v3827_v54 }
 0x29b   : > { %3537 = vmatmul.mubr.msk.bf16.vlgmr.msra.gmra.mrb[12].mxu0 %vm1328_vm4, %v1714_v34 }
 0x29c   : > { %3548 = vmatprep.mubr.msk.bf16.mxu0 %vm3828_vm5, %v3827_v54 }
 0x366   : > { %v1775_v57 = vpop.f32.mrb[8].mxu0  ;;  %v1839_v58 = vpop.f32.mrb[16].mxu1 }
 0x367   : > { %v1840_v59 = vadd.f32 %v3285_v53, %v1839_v58  ;;  %v3522_v60 = vpop.f32.mrb[9].mxu0  ;;  %v3530_v61 = vpop.f32.mrb[17].mxu1  ;;  %v1776_v0 = vadd.f32 %v3281_v55, %v1775_v57 }
 0x368   : > { %v1778_v62 = vpop.f32.mrb[10].mxu0  ;;  %v1842_v63 = vpop.f32.mrb[18].mxu1 }
 0x369   : > { %v4261_v1 = vpack.c.bf16 %v1840_v59, %v1840_v59  ;;  %v3523_v2 = vpop.f32.mrb[11].mxu0  ;;  %v3531_v3 = vpop.f32.mrb[19].mxu1  ;;  %v4272_v7 = vpack.c.bf16 %v1776_v0, %v1776_v0  ;;  %v1910_v59 = vld [vmem:[%s4562_s20] sm:$0xf] }
 0x36a   : > { %v2189_v62 = vsel %vm1978_vm7, %v1910_v59, 0 }
 0x36b   : > { %2027 = vrot.lane.b32.xlu1 %v4261_v1, %s3829_s15  ;;  %v1919_v5 = vsel %vm1914_vm6, %v4261_v1, 0 }
 0x36c   : > { %3541 = vmatpush3.bf16.xpose.msra.mxu1 %v1919_v5 }
 0x36d   : > { %3552 = vmatprep.subr.bf16.mxu1 %v3827_v54 }
 0x36e   : > { %v1903_v8 = vpop.f32.mrb[12].mxu0 }
 0x36f   : > { %v1904_v9 = vadd.f32 %v3289_v6, %v1903_v8  ;;  %v3538_v10 = vpop.f32.mrb[13].mxu0  ;;  %2024 = vrot.lane.b32.xlu1 %v4272_v7, %s3829_s15 }
 0x370   : > { %v1906_v11 = vpop.f32.mrb[14].mxu0 }
 0x371   : > { %v4277_v12 = vpack.c.bf16 %v1904_v9, %v1904_v9  ;;  %v3539_v13 = vpop.f32.mrb[15].mxu0 }
 0x373   : > { %3543 = vmatmul.mubr.msk.bf16.vlgmr.msra.gmra.mrb[20].mxu1 %vm1914_vm6, %v4272_v7  ;;  %v1980_v14 = vsel %vm1978_vm7, %v4277_v12, 0 }
 0x374   : > { %3547 = vmatpush3.bf16.msra.mxu0 %v1980_v14  ;;  %3554 = vmatprep.mubr.msk.bf16.mxu1 %vm3828_vm5, %v3827_v54 }
 0x375   : > { %3558 = vmatprep.subr.bf16.mxu0 %v3827_v54 }
 0x3dd   : > { %v2028_v15 = vpop.permute.xlu1 %2027 }
 0x3de   : > { %v2033_v16 = vsel %vm1914_vm6, %v2028_v15, 0 }
 0x3df   : > { %3553 = vmatpush3.bf16.xpose.msra.mxu1 %v2033_v16 }
 0x3e0   : > { %3564 = vmatprep.subr.bf16.mxu1 %v3827_v54 }
 0x3e1   : > { %v2025_v17 = vpop.permute.xlu1 %2024 }
 0x3e6   : > { %3555 = vmatmul.mubr.msk.bf16.vlgmr.msra.gmra.mrb[24].mxu1 %vm1914_vm6, %v2025_v17 }
 0x3e7   : > { %3566 = vmatprep.mubr.msk.bf16.mxu1 %vm3828_vm5, %v3827_v54  ;;  %3565 = vmatpush3.bf16.msra.mxu1 %v2143_v52 }
 0x3e8   : > { %3576 = vmatprep.subr.bf16.mxu1 %v3827_v54 }
 0x446   : > { %v1955_v18 = vpop.f32.mrb[20].mxu1 }
 0x447   : > { %v1961_v19 = vmul.f32 0.35355338, %v1955_v18  ;;  %v3544_v20 = vpop.f32.mrb[21].mxu1 }
 0x448   : > { %v1958_v21 = vpop.f32.mrb[22].mxu1 }
 0x449   : > { %v1962_v22 = vadd.f32 %v1961_v19, %v4010_v4  ;;  %v3545_v23 = vpop.f32.mrb[23].mxu1 }
 0x44b   : > { %v1963_v24 = vsel %vm1914_vm6, %v1962_v22, -inf }
 0x44c   : > { %1964 = vmax.xlane.f32.xlu0 %v1963_v24 }
 0x4b9   : > { %v2069_v25 = vpop.f32.mrb[24].mxu1 }
 0x4ba   : > { %v2075_v26 = vmul.f32 0.35355338, %v2069_v25  ;;  %v3556_v27 = vpop.f32.mrb[25].mxu1 }
 0x4bb   : > { %v2072_v28 = vpop.f32.mrb[26].mxu1 }
 0x4bc   : > { %v2076_v29 = vadd.f32 %v2075_v26, %v4010_v4  ;;  %v3557_v30 = vpop.f32.mrb[27].mxu1 }
 0x4be   : > { %v2077_v31 = vsel %vm1914_vm6, %v2076_v29, -inf }
 0x4bf   : > { %2078 = vmax.xlane.f32.xlu1 %v2077_v31 }
 0x4d0   : > { %2231 = vrot.lane.b32.xlu1 %v4272_v7, %s3830_s19 }
 0x4d9   : > { %v1965_v32 = vpop.xlane.xlu0 %1964 }
 0x4da   : > { %v1966_v33 = vsub.f32 %v1962_v22, %v1965_v32 }
 0x4dc   : > { %v1967_v34 = vmul.f32 1.442695, %v1966_v33 }
 0x4de   : > { %3756 = vpow2.f32 %v1967_v34 }
 0x4e8   : > { %v3757_v35 = vpop.eup %3756 }
 0x4e9   : > { %v1969_v37 = vsel %vm1914_vm6, %v3757_v35, 0.0 }
 0x4ea   : > { %1970 = vadd.xlane.f32.xlu0 %v1969_v37 }
 0x54c   : > { %v2079_v38 = vpop.xlane.xlu1 %2078 }
 0x54d   : > { %v2080_v39 = vsub.f32 %v2076_v29, %v2079_v38 }
 0x54f   : > { %v2081_v41 = vmul.f32 1.442695, %v2080_v39 }
 0x550   : > { %v2232_v15 = vpop.permute.xlu1 %2231 }
 0x551   : > { %3758 = vpow2.f32 %v2081_v41 }
 0x55b   : > { %v3759_v42 = vpop.eup %3758 }
 0x55c   : > { %v2083_v43 = vsel %vm1914_vm6, %v3759_v42, 0.0 }
 0x55d   : > { %2084 = vadd.xlane.f32.xlu0 %v2083_v43 }
 0x573   : > { %2090 = vrot.lane.b32.xlu0 %v4277_v12, %s3829_s15 }
 0x577   : > { %v1971_v45 = vpop.xlane.xlu0 %1970  ;;  %2233 = vrot.lane.b32.xlu0 %v4261_v1, %s3830_s19 }
 0x578   : > { %3760 = vrcp.f32 %v1971_v45 }
 0x582   : > { %v3761_v46 = vpop.eup %3760 }
 0x583   : > { %v1973_v47 = vmul.f32 %v3761_v46, %v3757_v35 }
 0x585   : > { %v1974_v49 = vpack.c.bf16 %v1973_v47, %v1973_v47 }
 0x587   : > { %3549 = vmatmul.mubr.msk.bf16.vlgmr.msra.gmra.mrb[16].mxu0 %vm1914_vm6, %v1974_v49 }
 0x588   : > { %3560 = vmatprep.mubr.msk.bf16.mxu0 %vm3828_vm5, %v3827_v54 }
 0x5ea   : > { %v2085_v53 = vpop.xlane.xlu0 %2084 }
 0x5eb   : > { %3762 = vrcp.f32 %v2085_v53 }
 0x5ee   : > { %v2091_v55 = vpop.permute.xlu0 %2090 }
 0x5ef   : > { %v2096_v57 = vsel %vm1978_vm7, %v2091_v55, 0 }
 0x5f0   : > { %3559 = vmatpush3.bf16.msra.mxu0 %v2096_v57 }
 0x5f1   : > { %3570 = vmatprep.subr.bf16.mxu0 %v3827_v54 }
 0x5f2   : > { %v2234_v6 = vpop.permute.xlu0 %2233 }
 0x5f3   : > { %v2239_v13 = vsel %vm1914_vm6, %v2234_v6, 0 }
 0x5f5   : > { %v3763_v58 = vpop.eup %3762 }
 0x5f6   : > { %v2087_v60 = vmul.f32 %v3763_v58, %v3759_v42 }
 0x5f8   : > { %v2088_v61 = vpack.c.bf16 %v2087_v60, %v2087_v60 }
 0x5fa   : > { %3561 = vmatmul.mubr.msk.bf16.vlgmr.msra.gmra.mrb[20].mxu0 %vm1914_vm6, %v2088_v61 }
 0x5fb   : > { %3571 = vmatpush3.bf16.msra.mxu0 %v2189_v62  ;;  %3572 = vmatprep.mubr.msk.bf16.mxu0 %vm3828_vm5, %v3827_v54 }
 0x5fc   : > { %3582 = vmatprep.subr.bf16.mxu0 %v3827_v54 }
 0x65a   : > { %v2016_v63 = vpop.f32.mrb[16].mxu0 }
 0x65b   : > { %v2022_v0 = vpack.c.bf16 %v2016_v63, %v2016_v63  ;;  %v3550_v2 = vpop.f32.mrb[17].mxu0 }
 0x65c   : > { %v2019_v3 = vpop.f32.mrb[18].mxu0 }
 0x65d   : > { %v3551_v5 = vpop.f32.mrb[19].mxu0  ;;  %3573 = vmatmul.mubr.msk.bf16.vlgmr.msra.gmra.mrb[24].mxu0 %vm1914_vm6, %v2022_v0 }
 0x65e   : > { %3584 = vmatprep.mubr.msk.bf16.mxu0 %vm3828_vm5, %v3827_v54 }
 0x6cd   : > { %v2132_v8 = vpop.f32.mrb[20].mxu0 }
 0x6ce   : > { %v2138_v9 = vpack.c.bf16 %v2132_v8, %v2132_v8  ;;  %v3562_v10 = vpop.f32.mrb[21].mxu0 }
 0x6cf   : > { %v2135_v11 = vpop.f32.mrb[22].mxu0  ;;  %v1913_v10 = vld [vmem:[%s4562_s20 + $0xc] sm:$0xf] }
 0x6d0   : > { %v3563_v14 = vpop.f32.mrb[23].mxu0  ;;  %3567 = vmatmul.mubr.msk.bf16.vlgmr.msra.gmra.mrb[28].mxu1 %vm1914_vm6, %v2138_v9  ;;  %v2508_v11 = vsel %vm1978_vm7, %v1913_v10, 0 }
 0x6d1   : > { %3577 = vmatpush3.bf16.xpose.msra.mxu1 %v2239_v13  ;;  %3578 = vmatprep.mubr.msk.bf16.mxu1 %vm3828_vm5, %v3827_v54 }
 0x6d2   : > { %3588 = vmatprep.subr.bf16.mxu1 %v3827_v54 }
 0x6d8   : > { %3579 = vmatmul.mubr.msk.bf16.vlgmr.msra.gmra.mrb[32].mxu1 %vm1914_vm6, %v2232_v15 }
 0x6d9   : > { %3590 = vmatprep.mubr.msk.bf16.mxu1 %vm3828_vm5, %v3827_v54 }
 0x730   : > { %v2225_v16 = vpop.f32.mrb[24].mxu0 }
 0x731   : > { %v3574_v17 = vpop.f32.mrb[25].mxu0 }
 0x732   : > { %v2228_v18 = vpop.f32.mrb[26].mxu0 }
 0x733   : > { %v3575_v19 = vpop.f32.mrb[27].mxu0 }
 0x7a3   : > { %v2179_v20 = vpop.f32.mrb[28].mxu1 }
 0x7a4   : > { %v4328_v21 = vadd.f32 %v2225_v16, %v2179_v20  ;;  %v3568_v22 = vpop.f32.mrb[29].mxu1 }
 0x7a5   : > { %v2182_v23 = vpop.f32.mrb[30].mxu1 }
 0x7a6   : > { %v3569_v24 = vpop.f32.mrb[31].mxu1 }
 0x7ab   : > { %v2275_v25 = vpop.f32.mrb[32].mxu1 }
 0x7ac   : > { %v2281_v26 = vmul.f32 0.35355338, %v2275_v25  ;;  %v3580_v27 = vpop.f32.mrb[33].mxu1 }
 0x7ad   : > { %v2278_v28 = vpop.f32.mrb[34].mxu1 }
 0x7ae   : > { %v2282_v29 = vadd.f32 %v2281_v26, %v4010_v4  ;;  %v3581_v30 = vpop.f32.mrb[35].mxu1  ;;  %v3250_v26 = vld [vmem:[%s4032_s6 + $0x2] ss:$0 sm:$0xff]  ;;  %v3305_v28 = vld [vmem:[%s4563_s23] ss:$0 sm:$0xff] }
 0x7b0   : > { %v2283_v31 = vsel %vm1914_vm6, %v2282_v29, -inf }
 0x7b1   : > { %2284 = vmax.xlane.f32.xlu0 %v2283_v31 }
 0x7c7   : > { %2295 = vrot.lane.b32.xlu0 %v4277_v12, %s3830_s19 }
 0x7cb   : > { %2391 = vrot.lane.b32.xlu0 %v4272_v7, %s3831_s27 }
 0x83e   : > { %v2285_v32 = vpop.xlane.xlu0 %2284 }
 0x83f   : > { %v2286_v33 = vsub.f32 %v2282_v29, %v2285_v32  ;;  %v1497_v32 = vadd.f32 %v3250_v26, %v4245_v40  ;;  %v3748_v40 = vld [vmem:[%s4068_s28] sm:$0xff]  }
 0x841   : > { %v2287_v34 = vmul.f32 1.442695, %v2286_v33 }
 0x842   : > { %v2296_v35 = vpop.permute.xlu0 %2295 }
 0x843   : > { %3764 = vpow2.f32 %v2287_v34  ;;  %v2301_v37 = vsel %vm1978_vm7, %v2296_v35, 0 }
 0x844   : > { %3583 = vmatpush3.bf16.msra.mxu0 %v2301_v37 }
 0x845   : > { %3594 = vmatprep.subr.bf16.mxu0 %v3827_v54 }
 0x846   : > { %v2392_v47 = vpop.permute.xlu0 %2391 }
 0x84d   : > { %v3765_v38 = vpop.eup %3764 }
 0x84e   : > { %v2289_v39 = vsel %vm1914_vm6, %v3765_v38, 0.0 }
 0x84f   : > { %2290 = vadd.xlane.f32.xlu1 %v2289_v39 }
 0x860   : > { %2393 = vrot.lane.b32.xlu1 %v4261_v1, %s3831_s27  ;;  %v1912_v1 = vld [vmem:[%s4562_s20 + $0x8] sm:$0xf] }
 0x861   : > { %v2348_v49 = vsel %vm1978_vm7, %v1912_v1, 0  ;;  %v3268_v1 = vld [vmem:[%s4032_s6 + $0x4] ss:$0 sm:$0xff] }
 0x862   : > { %3589 = vmatpush3.bf16.msra.mxu1 %v2348_v49  ;;  %v1627_v49 = vadd.f32 %v3268_v1, %v4249_v48  ;;  %v3752_v48 = vld [vmem:[%s4082_s14 + $0x10] sm:$0xff]  }
 0x863   : > { %3600 = vmatprep.subr.bf16.mxu1 %v3827_v54 }
 0x8dc   : > { %v2291_v41 = vpop.xlane.xlu1 %2290 }
 0x8dd   : > { %3766 = vrcp.f32 %v2291_v41 }
 0x8e0   : > { %v2394_v43 = vpop.permute.xlu1 %2393 }
 0x8e1   : > { %v2399_v46 = vsel %vm1914_vm6, %v2394_v43, 0 }
 0x8e7   : > { %v3767_v7 = vpop.eup %3766 }
 0x8e8   : > { %v2293_v42 = vmul.f32 %v3767_v7, %v3765_v38 }
 0x8ea   : > { %v2294_v45 = vpack.c.bf16 %v2293_v42, %v2293_v42 }
 0x8ec   : > { %3585 = vmatmul.mubr.msk.bf16.vlgmr.msra.gmra.mrb[28].mxu0 %vm1914_vm6, %v2294_v45  ;;  %v3749_v45 = vld [vmem:[%s4068_s28 + $0x8] sm:$0xff]  }
 0x8ed   : > { %3595 = vmatpush3.bf16.xpose.msra.mxu0 %v2399_v46  ;;  %3596 = vmatprep.mubr.msk.bf16.mxu0 %vm3828_vm5, %v3827_v54 }
 0x8ee   : > { %3606 = vmatprep.subr.bf16.mxu0 %v3827_v54 }
 0x8f4   : > { %3597 = vmatmul.mubr.msk.bf16.vlgmr.msra.gmra.mrb[32].mxu0 %vm1914_vm6, %v2392_v47 }
 0x8f5   : > { %3608 = vmatprep.mubr.msk.bf16.mxu0 %vm3828_vm5, %v3827_v54  ;;  %3607 = vmatpush3.bf16.msra.mxu0 %v2508_v11 }
 0x8f6   : > { %3620 = vmatprep.subr.bf16.mxu0 %v3827_v54 }
 0x9bf   : > { %v2337_v50 = vpop.f32.mrb[28].mxu0 }
 0x9c0   : > { %v2343_v52 = vpack.c.bf16 %v2337_v50, %v2337_v50  ;;  %v3586_v53 = vpop.f32.mrb[29].mxu0 }
 0x9c1   : > { %v2340_v55 = vpop.f32.mrb[30].mxu0  ;;  %v2574_v53 = vadd.f32 1.0, %v1627_v49 }
 0x9c2   : > { %v3587_v57 = vpop.f32.mrb[31].mxu0  ;;  %3591 = vmatmul.mubr.msk.bf16.vlgmr.msra.gmra.mrb[36].mxu1 %vm1914_vm6, %v2343_v52  ;;  %v3259_v52 = vld [vmem:[%s4032_s6 + $0x3] ss:$0 sm:$0xff] }
 0x9c3   : > { %3602 = vmatprep.mubr.msk.bf16.mxu1 %vm3828_vm5, %v3827_v54  ;;  %v1562_v57 = vadd.f32 %v3259_v52, %v4243_v36  ;;  %v3306_v36 = vld [vmem:[%s1034_s11] ss:$0 sm:$0xff]  ;;  %s4565_s11 = sld [smem:[#allocation4_spill]] }
 0x9c7   : > { %v2435_v58 = vpop.f32.mrb[32].mxu0 }
 0x9c8   : > { %v2441_v59 = vmul.f32 0.35355338, %v2435_v58  ;;  %v3598_v60 = vpop.f32.mrb[33].mxu0 }
 0x9c9   : > { %v2438_v61 = vpop.f32.mrb[34].mxu0  ;;  %p3316_p8 = scmp.ne.s32.totalorder %s4565_s11, 1 }
 0x9ca   : > { %v2442_v62 = vadd.f32 %v2441_v59, %v4010_v4  ;;  %v3599_v63 = vpop.f32.mrb[35].mxu0  ;;  %v3750_v61 = vld [vmem:[%s4082_s14] sm:$0xff]   ;;  %vm3833_vm9 = vmmov (!%p3316_p8), 0   ;;  %s4569_s5 = sld [smem:[#allocation28_spill]] (!%p3316_p8)  ;;  %s4570_s1 = sld [smem:[#allocation30_spill]] (!%p3316_p8) }
 0x9cb   : > { %v3753_v63 = vld [vmem:[%s4082_s14 + $0x18] sm:$0xff]  }
 0x9cc   : > { %v2443_v0 = vsel %vm1914_vm6, %v2442_v62, -inf }
 0x9cd   : > { %2444 = vmax.xlane.f32.xlu0 %v2443_v0 }
 0x9e3   : > { %2455 = vrot.lane.b32.xlu0 %v4277_v12, %s3831_s27  ;;  %s4568_s27 = sld [smem:[#allocation29_spill]] (!%p3316_p8) }
 0xa5a   : > { %v2445_v2 = vpop.xlane.xlu0 %2444 }
 0xa5b   : > { %v2446_v3 = vsub.f32 %v2442_v62, %v2445_v2  ;;  %v3751_v62 = vld [vmem:[%s4082_s14 + $0x8] sm:$0xff]  }
 0xa5d   : > { %v2447_v5 = vmul.f32 1.442695, %v2446_v3 }
 0xa5e   : > { %v2456_v6 = vpop.permute.xlu0 %2455 }
 0xa5f   : > { %3768 = vpow2.f32 %v2447_v5  ;;  %v2461_v8 = vsel %vm1978_vm7, %v2456_v6, 0 }
 0xa60   : > { %3601 = vmatpush3.bf16.msra.mxu1 %v2461_v8 }
 0xa61   : > { %3612 = vmatprep.subr.bf16.mxu1 %v3827_v54 }
 0xa69   : > { %v3769_v9 = vpop.eup %3768 }
 0xa6a   : > { %v2449_v4 = vsel %vm1914_vm6, %v3769_v9, 0.0 }
 0xa6b   : > { %2450 = vadd.xlane.f32.xlu1 %v2449_v4 }
 0xa95   : > { %v2384_v12 = vpop.f32.mrb[36].mxu1 }
 0xa96   : > { %v2390_v13 = vadd.f32 %v2384_v12, %v4328_v21  ;;  %v3592_v14 = vpop.f32.mrb[37].mxu1  ;;  %v3277_v12 = vld [vmem:[%s4032_s6 + $0x5] ss:$0 sm:$0xff] }
 0xa97   : > { %v2387_v15 = vpop.f32.mrb[38].mxu1 }
 0xa98   : > { %v3593_v16 = vpop.f32.mrb[39].mxu1  ;;  %v1692_v15 = vadd.f32 %v3277_v12, %v4247_v44 }
 0xaf8   : > { %v2451_v17 = vpop.xlane.xlu1 %2450 }
 0xaf9   : > { %3770 = vrcp.f32 %v2451_v17 }
 0xb03   : > { %v3771_v18 = vpop.eup %3770 }
 0xb04   : > { %v2453_v19 = vmul.f32 %v3771_v18, %v3769_v9 }
 0xb06   : > { %v2454_v20 = vpack.c.bf16 %v2453_v19, %v2453_v19 }
 0xb08   : > { %3603 = vmatmul.mubr.msk.bf16.vlgmr.msra.gmra.mrb[40].mxu1 %vm1914_vm6, %v2454_v20 }
 0xb09   : > { %3616 = vmatprep.mubr.msk.bf16.mxu1 %vm3828_vm5, %v3827_v54  ;;  %3613 = vmatpush3.bf16.msra.mxu1 %v3748_v40 }
 0xb0a   : > { %3614 = vmatprep.subr.bf16.mxu1 %v3827_v54 }
 0xb0d   : > { %3615 = vmatpush3.bf16.msra.mxu1 %v3749_v45  ;;  %v3326_v45 = vld [vmem:[%s4569_s5 + $0x1] ss:$0 sm:$0xff] (!%p3316_p8) }
 0xbdb   : > { %v2497_v22 = vpop.f32.mrb[40].mxu1 }
 0xbdc   : > { %v2503_v23 = vpack.c.bf16 %v2497_v22, %v2497_v22  ;;  %v3604_v24 = vpop.f32.mrb[41].mxu1 }
 0xbdd   : > { %v2500_v25 = vpop.f32.mrb[42].mxu1  ;;  %v3832_v24 = vmov (!%p3316_p8), 0.0  }
 0xbde   : > { %v3605_v21 = vpop.f32.mrb[43].mxu1  ;;  %3609 = vmatmul.mubr.msk.bf16.vlgmr.msra.gmra.mrb[36].mxu0 %vm1914_vm6, %v2503_v23  ;;  %3640 = vmatprep.subr.bf16.mxu1 (!%p3316_p8), %v3832_v24 }
 0xbdf   : > { %3628 = vmatprep.mubr.msk.bf16.mxu0 %vm3828_vm5, %v3827_v54  ;;  %3621 = vmatpush3.bf16.msra.mxu0 %v3750_v61 }
 0xbe0   : > { %3622 = vmatprep.subr.bf16.mxu0 %v3827_v54 }
 0xbe3   : > { %3623 = vmatpush3.bf16.msra.mxu0 %v3751_v62 }
 0xbe4   : > { %3624 = vmatprep.subr.bf16.mxu0 %v3827_v54 }
 0xbe7   : > { %3625 = vmatpush3.bf16.msra.mxu0 %v3752_v48 }
 0xbe8   : > { %3626 = vmatprep.subr.bf16.mxu0 %v3827_v54 }
 0xbeb   : > { %3627 = vmatpush3.bf16.msra.mxu0 %v3753_v63 }
 0xbec   : > { %3632 = vmatprep.subr.bf16.mxu0 (!%p3316_p8), %v3832_v24 }
 0xcb1   : > { %v2544_v27 = vpop.f32.mrb[36].mxu0 }
 0xcb2   : > { %v2550_v29 = vadd.f32 %v2544_v27, %v2390_v13  ;;  %v3610_v30 = vpop.f32.mrb[37].mxu0  ;;  %v3310_v13 = vld [vmem:[%s1042_s29] ss:$0 sm:$0xff]  ;;  %s4566_s29 = sld [smem:[#allocation27_spill]] (!%p3316_p8) }
 0xcb3   : > { %v2547_v31 = vpop.f32.mrb[38].mxu0 }
 0xcb4   : > { %v2558_v33 = vadd.f32 %v3305_v28, %v2550_v29  ;;  %v3611_v34 = vpop.f32.mrb[39].mxu0 }
 0xcb6   : > { %v2559_v35 = vmul.f32 %v2558_v33, %v1497_v32  ;;  %v3780_v32 = vld [vmem:[%s4568_s27] sm:$0xff] (!%p3316_p8)   ;;  %v3781_v33 = vld [vmem:[%s4568_s27 + $0x8] sm:$0xff] (!%p3316_p8)  }
 0xcb8   : > { %v4380_v37 = vadd.f32 %v2559_v35, %v4158_v51  ;;  %s4567_s13 = smov (!%p3316_p8), %s4566_s29  ;;  %v3776_v44 = vld [vmem:[%s4566_s29 + $0x10] sm:$0xff] (!%p3316_p8)  }
 0xcb9   : > { %v3777_v25 = vld [vmem:[%s4567_s13] sm:$0xff] (!%p3316_p8)   ;;  %v3778_v21 = vld [vmem:[%s4567_s13 + $0x18] sm:$0xff] (!%p3316_p8)   ;;  %v3779_v26 = vld [vmem:[%s4567_s13 + $0x8] sm:$0xff] (!%p3316_p8)  }
 0xcba   : > { %v2561_v38 = vsel %vm1328_vm4, %v4380_v37, 0.0 }
 0xcbb   : > { %2562 = vadd.xlane.f32.xlu1 %v2561_v38 }
 0xd48   : > { %v2563_v39 = vpop.xlane.xlu1 %2562 }
 0xd49   : > { %v2564_v41 = vmul.f32 0.03125, %v2563_v39 }
 0xd4b   : > { %v2565_v7 = vsub.f32 %v4380_v37, %v2564_v41 }
 0xd4d   : > { %v2566_v42 = vmul.f32 %v2565_v7, %v2565_v7 }
 0xd4f   : > { %v2567_v43 = vsel %vm1328_vm4, %v2566_v42, 0.0 }
 0xd50   : > { %2568 = vadd.xlane.f32.xlu1 %v2567_v43 }
 0xddd   : > { %v2569_v51 = vpop.xlane.xlu1 %2568 }
 0xdde   : > { %v2570_v46 = vmul.f32 0.03125, %v2569_v51 }
 0xde0   : > { %v2571_v47 = vadd.f32 1e-06, %v2570_v46  ;;  %v3317_v46 = vld [vmem:[%s4569_s5] ss:$0 sm:$0xff] (!%p3316_p8) }
 0xde2   : > { %3772 = vrsqrt.f32 %v2571_v47 }
 0xdec   : > { %v3773_v50 = vpop.eup %3772 }
 0xded   : > { %v2573_v55 = vmul.f32 %v3773_v50, %v2565_v7 }
 0xdef   : > { %v2575_v58 = vmul.f32 %v2574_v53, %v2573_v55 }
 0xdf1   : > { %v2576_v59 = vadd.f32 %v2575_v58, %v1562_v57  ;;  %v3330_v57 = vld [vmem:[%s4570_s1] ss:$0 sm:$0xff] (!%p3316_p8) }
 0xdf3   : > { %v2577_v60 = vpack.c.bf16 %v2576_v59, %v2576_v59 }
 0xdf5   : > { %3617 = vmatmul.mubr.msk.bf16.vlgmr.msra.gmra.mrb[44].mxu1 %vm1328_vm4, %v2577_v60 }
 0xdf6   : > { %3644 = vmatprep.mubr.msk.bf16.mxu1 (!%p3316_p8), %vm3833_vm9, %v3832_v24  ;;  %3641 = vmatpush3.bf16.msra.mxu1 (!%p3316_p8), %v3776_v44 }
 0xdf7   : > { %3642 = vmatprep.subr.bf16.mxu1 (!%p3316_p8), %v3832_v24 }
 0xdfa   : > { %3643 = vmatpush3.bf16.msra.mxu1 (!%p3316_p8), %v3778_v21 }
 0xdfd   : > { %3645 = vmatmul.mubr.msk.bf16.vlgmr.msra.gmra.mrb[0].mxu1 (!%p3316_p8), %vm1328_vm4, %v4169_v56 }
 0xec8   : > { %v2638_v0 = vpop.f32.mrb[44].mxu1 }
 0xec9   : > { %v2639_v2 = vadd.f32 %v3306_v36, %v2638_v0  ;;  %v3618_v3 = vpop.f32.mrb[45].mxu1 }
 0xeca   : > { %v2641_v5 = vpop.f32.mrb[46].mxu1 }
 0xecb   : > { %v2645_v6 = vmul.f32 0.70710677, %v2639_v2  ;;  %v3619_v8 = vpop.f32.mrb[47].mxu1  ;;  %v2644_v4 = vmul.f32 0.5, %v2639_v2 }
 0xecd   : > { %3774 = verf.f32 %v2645_v6 }
 0xed7   : > { %v3775_v9 = vpop.eup %3774 }
 0xed8   : > { %v2647_v10 = vadd.f32 1.0, %v3775_v9 }
 0xeda   : > { %v2648_v54 = vmul.f32 %v2647_v10, %v2644_v4 }
 0xedc   : > { %v2649_v11 = vpack.c.bf16 %v2648_v54, %v2648_v54 }
 0xede   : > { %3629 = vmatmul.mubr.msk.bf16.vlgmr.msra.gmra.mrb[40].mxu0 %vm2689_vm8, %v2649_v11 }
 0xedf   : > { %3636 = vmatprep.mubr.msk.bf16.mxu0 (!%p3316_p8), %vm3833_vm9, %v3832_v24  ;;  %3633 = vmatpush3.bf16.msra.mxu0 (!%p3316_p8), %v3777_v25 }
 0xee0   : > { %3634 = vmatprep.subr.bf16.mxu0 (!%p3316_p8), %v3832_v24 }
 0xee3   : > { %3635 = vmatpush3.bf16.msra.mxu0 (!%p3316_p8), %v3779_v26 }
 0xee4   : > { %3648 = vmatprep.subr.bf16.mxu0 (!%p3316_p8), %v3832_v24 }
 0xee6   : > { %3637 = vmatmul.mubr.msk.bf16.vlgmr.msra.gmra.mrb[0].mxu0 (!%p3316_p8), %vm1328_vm4, %v4169_v56  ;;  %v2862_v56 = vpop.f32.mrb[0].mxu1 (!%p3316_p8) }
 0xee7   : > { %3652 = vmatprep.mubr.msk.bf16.mxu0 (!%p3316_p8), %vm3833_vm9, %v3832_v24  ;;  %3649 = vmatpush3.bf16.msra.mxu0 (!%p3316_p8), %v3780_v32  ;;  %v3646_v34 = vpop.f32.mrb[1].mxu1 (!%p3316_p8)  ;;  %v2863_v51 = vadd.f32 (!%p3316_p8), %v3326_v45, %v2862_v56 }
 0xee8   : > { %3650 = vmatprep.subr.bf16.mxu0 (!%p3316_p8), %v3832_v24 }
 0xee9   : > { %v2881_v47 = vadd.f32 (!%p3316_p8), 1.0, %v2863_v51 }
 0xeeb   : > { %3651 = vmatpush3.bf16.msra.mxu0 (!%p3316_p8), %v3781_v33 }
 0xfb1   : > { %v2727_v14 = vpop.f32.mrb[40].mxu0 }
 0xfb2   : > { %v2728_v16 = vadd.f32 %v3310_v13, %v2727_v14  ;;  %v3630_v17 = vpop.f32.mrb[41].mxu0  ;;  %2739 = sbr.rel (%p3316_p8) target bundleno = 4554 (0x11ca), region = 128 }
 0xfb3   : > { %v2730_v18 = vpop.f32.mrb[42].mxu0 }
 0xfb4   : > { %v2733_v19 = vmul.f32 %v2728_v16, %v1692_v15  ;;  %v3631_v20 = vpop.f32.mrb[43].mxu0 }
 0xfb6   : > { %v2734_v22 = vadd.f32 %v2733_v19, %v4380_v37  ;;  %v2865_v37 = vpop.f32.mrb[2].mxu1 (!%p3316_p8) }
 0xfb7   : > { %v3647_v39 = vpop.f32.mrb[3].mxu1 (!%p3316_p8) }
 0xfb8   : > { %2735 = vst.msk [vmem:[#allocation2] sm:$0xff] %vm1328_vm4, %v2734_v22  ;;  %v2868_v23 = vsel (!%p3316_p8), %vm1328_vm4, %v2734_v22, 0.0 }
 0xfb9   : > { %2869 = vadd.xlane.f32.xlu0 %v2868_v23  ;;  %v2797_v35 = vpop.f32.mrb[0].mxu0 }
 0xfba   : > { %v3638_v38 = vpop.f32.mrb[1].mxu0  ;;  %v2798_v50 = vadd.f32 %v3317_v46, %v2797_v35 }
 0xfbb   : > { %v2800_v41 = vpop.f32.mrb[2].mxu0 }
 0xfbc   : > { %v3639_v7 = vpop.f32.mrb[3].mxu0 }
0x1046   : > { %v2870_v27 = vpop.xlane.xlu0 %2869 }
0x1047   : > { %v2871_v28 = vmul.f32 0.03125, %v2870_v27 }
0x1049   : > { %v2872_v29 = vsub.f32 %v2734_v22, %v2871_v28 }
0x104b   : > { %v2873_v30 = vmul.f32 %v2872_v29, %v2872_v29 }
0x104d   : > { %v2874_v31 = vsel %vm1328_vm4, %v2873_v30, 0.0 }
0x104e   : > { %2875 = vadd.xlane.f32.xlu0 %v2874_v31 }
0x10db   : > { %v2876_v42 = vpop.xlane.xlu0 %2875 }
0x10dc   : > { %v2877_v43 = vmul.f32 0.03125, %v2876_v42 }
0x10de   : > { %v2878_v40 = vadd.f32 1e-06, %v2877_v43 }
0x10e0   : > { %3782 = vrsqrt.f32 %v2878_v40 }
0x10ea   : > { %v3783_v1 = vpop.eup %3782 }
0x10eb   : > { %v2880_v49 = vmul.f32 %v3783_v1, %v2872_v29 }
0x10ed   : > { %v2882_v52 = vmul.f32 %v2881_v47, %v2880_v49 }
0x10ef   : > { %v2883_v53 = vadd.f32 %v2882_v52, %v2798_v50 }
0x10f1   : > { %v2884_v55 = vpack.c.bf16 %v2883_v53, %v2883_v53 }
0x10f3   : > { %3653 = vmatmul.mubr.msk.bf16.vlgmr.msra.gmra.mrb[4].mxu0 %vm1328_vm4, %v2884_v55 }
0x11c6   : > { %v2945_v58 = vpop.f32.mrb[4].mxu0 }
0x11c7   : > { %v2946_v59 = vadd.f32 %v3330_v57, %v2945_v58  ;;  %v3654_v60 = vpop.f32.mrb[5].mxu0 }
0x11c8   : > { %v2948_v61 = vpop.f32.mrb[6].mxu0 }
0x11c9   : > { %2951 = vst [vmem:[%s1046_s24] sm:$0xff] %v2946_v59  ;;  %v3655_v62 = vpop.f32.mrb[7].mxu0 }
0x11ca PF: > { %s4572_s15 = sld [smem:[#allocation7_spill]]  ;;  %s4573_s29 = sld [smem:[#allocation5_spill]] }
0x11cb   : > { %s4574_s2 = sld [smem:[#allocation6_spill]]  ;;  %s4575_s6 = sld [smem:[#allocation8_spill]] }
0x11cc   : > { %s4576_s30 = sld [smem:[#allocation9_spill]] }
0x11d0   : > { %s35_s7 = sadd.s32 1, %s4572_s15  }
0x11d1   : > { %p32_p9 = scmp.ge.s32.totalorder %s35_s7, 6  }
0x11d3   :  { %34 = sbr.rel (!%p32_p9) target bundleno = 22 (0x16), region = 218 }

</bundles_post_ra>
